<compile_context>
chip_gen: v5e
topology: v5e:2x2
jax: 0.10.0
libtpu: 0.0.40
codegen_flags: <defaults>
</compile_context>

<pallas_src>
import jax
import jax.numpy as jnp
from jax import lax
from jax.experimental import pallas as pl
from jax.experimental.pallas import tpu as pltpu

SAMPLING_RATE = 44100
SINE_AMP = 0.1
NOISE_STD = 0.003
VOICED_THRESHOLD = 0.0
HARMONIC_NUM = 7                      # dim = harmonic_num + 1 harmonics


def _sinegen_kernel(wc_ref, ws_ref, bias_ref, f0_ref, nz_ref, out_ref,
                    tri_ref, stri_ref, carry_ref):
    """One grid step: one batch element x NS sub-chunk rows of C time samples each."""
    b = pl.program_id(0)
    s = pl.program_id(1)
    _, NS, C = f0_ref.shape
    D = wc_ref.shape[1]

    # Build both triangular cumsum operators and reset the carried phase once per batch element.
    # (Kept per-batch, not per-invocation, so the batch axis can be "parallel" on v7x megacore.)
    @pl.when(s == 0)
    def _init():
        kk = lax.broadcasted_iota(jnp.int32, (C, C), 0)
        jj = lax.broadcasted_iota(jnp.int32, (C, C), 1)
        tri_ref[...] = (kk <= jj).astype(jnp.float32)        # within-row inclusive cumsum operator
        ii = lax.broadcasted_iota(jnp.int32, (NS, NS), 0)
        rr = lax.broadcasted_iota(jnp.int32, (NS, NS), 1)
        stri_ref[...] = (rr < ii).astype(jnp.float32)         # strictly-earlier-rows operator
        carry_ref[...] = jnp.zeros_like(carry_ref)

    f0 = f0_ref[0]                                            # (NS, C)

    # Per-sample phase increment of the fundamental, wrapped to [0, 1)   (torch: f0 / sr % 1).
    rad0 = f0 * (1.0 / SAMPLING_RATE)
    rad0 = rad0 - jnp.floor(rad0)

    # ---- blocked cumulative phase (everything re-wrapped mod 1 for f32 safety) ----
    csum = jnp.dot(rad0, tri_ref[...], preferred_element_type=jnp.float32,
                   precision=lax.Precision.HIGHEST)           # (NS, C) within-row inclusive cumsum (MXU)
    row_tot = csum[:, C - 1:C]                                # (NS, 1) per-row totals (free: last column)
    row_tot = row_tot - jnp.floor(row_tot)                    # mod 1
    excl = jnp.dot(stri_ref[...], row_tot, preferred_element_type=jnp.float32,
                   precision=lax.Precision.HIGHEST)           # (NS, 1) exclusive row prefix (mod-1 equiv.)
    base = carry_ref[...] + excl                              # (NS, 1) phase at the start of each row
    base = base - jnp.floor(base)                             # re-wrap per row

    # Advance the carry by this block's total and re-wrap (keeps precision for arbitrarily long T).
    new_carry = base[NS - 1:NS, :] + row_tot[NS - 1:NS, :]
    carry_ref[...] = new_carry - jnp.floor(new_carry)

    ph0 = base + csum                                         # (NS, C) fundamental phase
    ph0 = ph0 - jnp.floor(ph0)
    ang = (2.0 * jnp.pi) * ph0
    s1 = jnp.sin(ang)                                         # only 1 sin + 1 cos per sample total
    c1 = jnp.cos(ang)

    # ---- voiced/unvoiced gating and noise amplitude (shared by all harmonics) ----
    uv = (f0 > VOICED_THRESHOLD).astype(jnp.float32)
    noise_amp = uv * NOISE_STD + (1.0 - uv) * (SINE_AMP / 3.0)
    amp_uv = uv * SINE_AMP

    # ---- harmonics via angle-addition recurrence, fused with the merge Linear(D -> 1) ----
    # sin(k*ang + 2*pi*r_h) = sin(k*ang)*cos(2*pi*r_h) + cos(k*ang)*sin(2*pi*r_h); the merge weight
    # w_h is pre-folded into wc = w*cos(2*pi*r), ws = w*sin(2*pi*r) (SMEM scalar tables).
    nyq = float(SAMPLING_RATE // 2)
    sk, ck = s1, c1
    acc = jnp.zeros_like(f0)
    for h in range(D):                                        # static unroll over harmonics
        if h > 0:                                             # (s,c) -> (s*c1 + c*s1, c*c1 - s*s1)
            sk, ck = sk * c1 + ck * s1, ck * c1 - sk * s1
        contrib = sk * wc_ref[b, h] + ck * ws_ref[b, h]
        contrib = jnp.where(f0 > nyq / float(h + 1), 0.0, contrib)   # zero harmonics above Nyquist
        acc = acc + contrib
    out_ref[0] = jnp.tanh(acc * amp_uv + noise_amp * nz_ref[0] + bias_ref[0])


def _default_chunk_cols():
    """256 matches the 2x256x256 MXU on v6e/v7x; 128 matches the 4x128x128 MXU on v5e and older."""
    try:
        kind = jax.devices()[0].device_kind.lower()
        return 256 if ("v6" in kind or "v7" in kind) else 128
    except Exception:
        return 128


def sine_gen(f0, rand_ini, noise, merge_w, merge_b, *,
             rows_per_step: int = 128, chunk_cols=None):
    """SineGen.forward: f0 [B, 1, T] -> [B, 1, T]."""
    B, ch, T = f0.shape
    assert ch == 1, "SineGen expects a single f0 channel"
    D = noise.shape[1]
    C = chunk_cols if chunk_cols is not None else _default_chunk_cols()

    merge_w = merge_w.astype(jnp.float32)
    merge_b = merge_b.astype(jnp.float32)
    rand_ini = rand_ini.astype(jnp.float32)

    # Fold the merge Linear into scalar tables / the noise so the kernel streams a single channel.
    two_pi = 2.0 * jnp.pi
    wc = merge_w[None, :] * jnp.cos(two_pi * rand_ini)                      # (B, D)
    ws = merge_w[None, :] * jnp.sin(two_pi * rand_ini)                      # (B, D)
    noise_m = jnp.einsum("d,bdt->bt", merge_w, noise.astype(jnp.float32))   # (B, T)

    # Adaptive time tiling: NS rows (sublanes, mult of 8) x C lanes per grid step; pad T with zeros
    # (padding reads as unvoiced, uv = 0) and slice the tail off the output.
    S_min = pl.cdiv(T, C)
    NS = max(8, ((min(rows_per_step, S_min) + 7) // 8) * 8)
    n_steps = pl.cdiv(S_min, NS)
    S = n_steps * NS
    T_pad = S * C

    f0_flat = f0.reshape(B, T).astype(jnp.float32)
    if T_pad != T:
        f0_flat = jnp.pad(f0_flat, ((0, 0), (0, T_pad - T)))
        noise_m = jnp.pad(noise_m, ((0, 0), (0, T_pad - T)))
    f0s = f0_flat.reshape(B, S, C)
    nzs = noise_m.reshape(B, S, C)

    out = pl.pallas_call(
        _sinegen_kernel,
        out_shape=jax.ShapeDtypeStruct((B, S, C), jnp.float32),
        grid=(B, n_steps),
        in_specs=[
            pl.BlockSpec(memory_space=pltpu.MemorySpace.SMEM),       # wc  (B, D) scalars
            pl.BlockSpec(memory_space=pltpu.MemorySpace.SMEM),       # ws  (B, D) scalars
            pl.BlockSpec(memory_space=pltpu.MemorySpace.SMEM),       # merge bias (1,)
            pl.BlockSpec((1, NS, C), lambda b, s: (b, s, 0)),        # f0 tile
            pl.BlockSpec((1, NS, C), lambda b, s: (b, s, 0)),        # merged-noise tile
        ],
        out_specs=pl.BlockSpec((1, NS, C), lambda b, s: (b, s, 0)),
        scratch_shapes=[
            pltpu.VMEM((C, C), jnp.float32),    # upper-tri ones (built once per batch element)
            pltpu.VMEM((NS, NS), jnp.float32),  # strict-lower-tri ones for the row prefix
            pltpu.VMEM((1, 1), jnp.float32),    # carried base phase (wrapped mod 1)
        ],
        compiler_params=pltpu.CompilerParams(
            dimension_semantics=("parallel", "arbitrary")),   # batch -> v7x's 2 TCs; time sequential
    )(wc, ws, merge_b, f0s, nzs)

    return out.reshape(B, 1, T_pad)[:, :, :T]


def sine_gen_ref(f0, rand_ini, noise, merge_w, merge_b):
    """Pure-JAX reference mirroring the PyTorch SineGen.forward."""
    D = noise.shape[1]
    f0t = jnp.transpose(f0, (0, 2, 1)).astype(jnp.float32)            # (B, T, 1)
    harm = jnp.arange(1, D + 1, dtype=jnp.float32)
    f0_buf = f0t * harm                                               # (B, T, D)
    rad = (f0_buf / SAMPLING_RATE) % 1.0
    rad = rad.at[:, 0, :].add(rand_ini)
    phase = jnp.cumsum(rad, axis=1) % 1.0                             # == torch cumsum_shift trick mod 1
    sines = jnp.sin(2.0 * jnp.pi * phase)
    sines = jnp.where(f0_buf > (SAMPLING_RATE // 2), 0.0, sines)
    sine_waves = sines * SINE_AMP
    uv = (f0t > VOICED_THRESHOLD).astype(jnp.float32)
    noise_amp = uv * NOISE_STD + (1.0 - uv) * (SINE_AMP / 3.0)
    x = sine_waves * uv + noise_amp * jnp.transpose(noise, (0, 2, 1))
    y = jnp.tanh(jnp.sum(x * merge_w, axis=-1, keepdims=True) + merge_b)
    return jnp.transpose(y, (0, 2, 1))                                # (B, 1, T)


if __name__ == "__main__":
    key = jax.random.PRNGKey(0)
    k_f0, k_ini, k_noise, k_w, k_b = jax.random.split(key, 5)

    B, T = 2, 4000                       # not a tile multiple -> exercises the padding path
    D = HARMONIC_NUM + 1

    # Voiced f0 in [80, 400] Hz, last quarter unvoiced (f0 = 0); NCT layout [B, 1, T].
    f0 = jax.random.uniform(k_f0, (B, 1, T), minval=80.0, maxval=400.0, dtype=jnp.float32)
    f0 = f0 * (jnp.arange(T)[None, None, :] < (3 * T) // 4).astype(jnp.float32)

    # torch.rand(B, dim) with rand_ini[:, 0] = 0 (zero initial phase for the fundamental).
    rand_ini = jax.random.uniform(k_ini, (B, D), dtype=jnp.float32).at[:, 0].set(0.0)
    # torch.randn_like(sine_waves): one standard-normal draw per (b, harmonic, t).
    noise = jax.random.normal(k_noise, (B, D, T), dtype=jnp.float32)
    # merge = Linear(D, 1) + Tanh   (torch default U(-1/sqrt(D), 1/sqrt(D)) init).
    lim = 1.0 / (D ** 0.5)
    merge_w = jax.random.uniform(k_w, (D,), minval=-lim, maxval=lim, dtype=jnp.float32)
    merge_b = jax.random.uniform(k_b, (1,), minval=-lim, maxval=lim, dtype=jnp.float32)

    ref = sine_gen_ref(f0, rand_ini, noise, merge_w, merge_b)

    # Small tiles: several sequential time steps per batch element (exercises the phase carry).
    out_small = sine_gen(f0, rand_ini, noise, merge_w, merge_b,
                         rows_per_step=8, chunk_cols=128)
    out_small = jax.block_until_ready(out_small)
    assert out_small.shape == (B, 1, T)
    assert bool(jnp.all(jnp.isfinite(out_small)))
    err_small = float(jnp.max(jnp.abs(out_small - ref)))
    assert err_small < 3e-2, f"small-tile kernel/reference mismatch: max abs err = {err_small}"

    # Default (production) tiling: large lane-dense tiles, hardware-matched chunk_cols.
    out_big = sine_gen(f0, rand_ini, noise, merge_w, merge_b)
    out_big = jax.block_until_ready(out_big)
    assert out_big.shape == (B, 1, T)
    err_big = float(jnp.max(jnp.abs(out_big - ref)))
    assert err_big < 3e-2, f"default-tile kernel/reference mismatch: max abs err = {err_big}"

    print("KERNEL_OK")
</pallas_src>

<mosaic_0001>
module attributes {stable_mosaic.version = 11 : i64} {
  func.func @_sinegen_kernel(%arg0: i32, %arg1: i32, %arg2: memref<2x8xf32, #tpu.memory_space<smem>>, %arg3: memref<2x8xf32, #tpu.memory_space<smem>>, %arg4: memref<1xf32, #tpu.memory_space<smem>>, %arg5: memref<1x8x128xf32, #tpu.memory_space<vmem>>, %arg6: memref<1x8x128xf32, #tpu.memory_space<vmem>>, %arg7: memref<1x8x128xf32, #tpu.memory_space<vmem>>, %arg8: memref<128x128xf32, #tpu.memory_space<vmem>>, %arg9: memref<8x8xf32, #tpu.memory_space<vmem>>, %arg10: memref<1x1xf32, #tpu.memory_space<vmem>>) attributes {dimension_semantics = [#tpu.dimension_semantics<parallel>, #tpu.dimension_semantics<arbitrary>], iteration_bounds = array<i64: 2, 4>, scalar_prefetch = 0 : i64, scratch_operands = 3 : i64, tpu.core_type = #tpu.core_type<tc>, window_params = [{transform_indices = @transform_0, window_bounds = array<i64: 2, 8>}, {transform_indices = @transform_1, window_bounds = array<i64: 2, 8>}, {transform_indices = @transform_2, window_bounds = array<i64: 1>}, {transform_indices = @transform_3, window_bounds = array<i64: 1, 8, 128>}, {transform_indices = @transform_4, window_bounds = array<i64: 1, 8, 128>}, {transform_indices = @transform_5, window_bounds = array<i64: 1, 8, 128>}]} {
    %c0_i32 = arith.constant 0 : i32
    %0 = arith.cmpi eq, %arg1, %c0_i32 : i32
    %1 = arith.extui %0 : i1 to i32
    %c0_i32_0 = arith.constant 0 : i32
    %2 = arith.cmpi ne, %1, %c0_i32_0 : i32
    scf.if %2 {
      %215 = tpu.iota {dimensions = array<i32: 0>} : vector<128x128xi32>
      %216 = tpu.iota {dimensions = array<i32: 1>} : vector<128x128xi32>
      %217 = arith.cmpi sle, %215, %216 : vector<128x128xi32>
      %218 = arith.extui %217 : vector<128x128xi1> to vector<128x128xi32>
      %219 = arith.sitofp %218 : vector<128x128xi32> to vector<128x128xf32>
      %c0_52 = arith.constant 0 : index
      %c0_53 = arith.constant 0 : index
      %220 = vector.load %arg8[%c0_52, %c0_53] : memref<128x128xf32, #tpu.memory_space<vmem>>, vector<128x128xf32>
      tpu.vector_store %arg8[%c0_52, %c0_53], %219 {strides = array<i32>} : memref<128x128xf32, #tpu.memory_space<vmem>>, vector<128x128xf32>,
      %221 = tpu.iota {dimensions = array<i32: 0>} : vector<8x8xi32>
      %222 = tpu.iota {dimensions = array<i32: 1>} : vector<8x8xi32>
      %223 = arith.cmpi slt, %222, %221 : vector<8x8xi32>
      %224 = arith.extui %223 : vector<8x8xi1> to vector<8x8xi32>
      %225 = arith.sitofp %224 : vector<8x8xi32> to vector<8x8xf32>
      %c0_54 = arith.constant 0 : index
      %c0_55 = arith.constant 0 : index
      %226 = vector.load %arg9[%c0_54, %c0_55] : memref<8x8xf32, #tpu.memory_space<vmem>>, vector<8x8xf32>
      tpu.vector_store %arg9[%c0_54, %c0_55], %225 {strides = array<i32>} : memref<8x8xf32, #tpu.memory_space<vmem>>, vector<8x8xf32>,
      %cst_56 = arith.constant 0.000000e+00 : f32
      %227 = vector.broadcast %cst_56 : f32 to vector<1x1xf32>
      %c0_57 = arith.constant 0 : index
      %c0_58 = arith.constant 0 : index
      %228 = vector.load %arg10[%c0_57, %c0_58] : memref<1x1xf32, #tpu.memory_space<vmem>>, vector<1x1xf32>
      tpu.vector_store %arg10[%c0_57, %c0_58], %227 {strides = array<i32>} : memref<1x1xf32, #tpu.memory_space<vmem>>, vector<1x1xf32>,
    } else {
    }
    %c0 = arith.constant 0 : index
    %c0_1 = arith.constant 0 : index
    %c0_2 = arith.constant 0 : index
    %3 = vector.load %arg5[%c0, %c0_1, %c0_2] : memref<1x8x128xf32, #tpu.memory_space<vmem>>, vector<1x8x128xf32>
    %4 = vector.shape_cast %3 : vector<1x8x128xf32> to vector<8x128xf32>
    %cst = arith.constant 2.26757365E-5 : f32
    %5 = vector.broadcast %cst : f32 to vector<8x128xf32>
    %6 = arith.mulf %4, %5 : vector<8x128xf32>
    %7 = math.floor %6 : vector<8x128xf32>
    %8 = arith.subf %6, %7 : vector<8x128xf32>
    %c0_3 = arith.constant 0 : index
    %c0_4 = arith.constant 0 : index
    %9 = vector.load %arg8[%c0_3, %c0_4] : memref<128x128xf32, #tpu.memory_space<vmem>>, vector<128x128xf32>
    %cst_5 = arith.constant dense<0.000000e+00> : vector<8x128xf32>
    %10 = tpu.matmul %8, %9, %cst_5 {dimension_numbers = #tpu.dot_dimension_numbers<[1], [0], [0], [1], [0, 0, 1, 1], [], []>, precision = #tpu.contract_precision<fp32>} : vector<8x128xf32>, vector<128x128xf32>, vector<8x128xf32> -> vector<8x128xf32>
    %11 = vector.extract_strided_slice %10 {offsets = [0, 127], sizes = [8, 1], strides = [1, 1]} : vector<8x128xf32> to vector<8x1xf32>
    %12 = math.floor %11 : vector<8x1xf32>
    %13 = arith.subf %11, %12 : vector<8x1xf32>
    %c0_6 = arith.constant 0 : index
    %c0_7 = arith.constant 0 : index
    %14 = vector.load %arg9[%c0_6, %c0_7] : memref<8x8xf32, #tpu.memory_space<vmem>>, vector<8x8xf32>
    %cst_8 = arith.constant dense<0.000000e+00> : vector<8x1xf32>
    %15 = tpu.matmul %14, %13, %cst_8 {dimension_numbers = #tpu.dot_dimension_numbers<[1], [0], [0], [1], [0, 0, 1, 1], [], []>, precision = #tpu.contract_precision<fp32>} : vector<8x8xf32>, vector<8x1xf32>, vector<8x1xf32> -> vector<8x1xf32>
    %c0_9 = arith.constant 0 : index
    %c0_10 = arith.constant 0 : index
    %16 = vector.load %arg10[%c0_9, %c0_10] : memref<1x1xf32, #tpu.memory_space<vmem>>, vector<1x1xf32>
    %17 = vector.broadcast %16 : vector<1x1xf32> to vector<8x1xf32>
    %18 = arith.addf %17, %15 : vector<8x1xf32>
    %19 = math.floor %18 : vector<8x1xf32>
    %20 = arith.subf %18, %19 : vector<8x1xf32>
    %21 = vector.extract_strided_slice %20 {offsets = [7, 0], sizes = [1, 1], strides = [1, 1]} : vector<8x1xf32> to vector<1x1xf32>
    %22 = vector.extract_strided_slice %13 {offsets = [7, 0], sizes = [1, 1], strides = [1, 1]} : vector<8x1xf32> to vector<1x1xf32>
    %23 = arith.addf %21, %22 : vector<1x1xf32>
    %24 = math.floor %23 : vector<1x1xf32>
    %25 = arith.subf %23, %24 : vector<1x1xf32>
    %c0_11 = arith.constant 0 : index
    %c0_12 = arith.constant 0 : index
    %26 = vector.load %arg10[%c0_11, %c0_12] : memref<1x1xf32, #tpu.memory_space<vmem>>, vector<1x1xf32>
    tpu.vector_store %arg10[%c0_11, %c0_12], %25 {strides = array<i32>} : memref<1x1xf32, #tpu.memory_space<vmem>>, vector<1x1xf32>,
    %27 = vector.broadcast %20 : vector<8x1xf32> to vector<8x128xf32>
    %28 = arith.addf %27, %10 : vector<8x128xf32>
    %29 = math.floor %28 : vector<8x128xf32>
    %30 = arith.subf %28, %29 : vector<8x128xf32>
    %cst_13 = arith.constant 6.28318548 : f32
    %31 = vector.broadcast %cst_13 : f32 to vector<8x128xf32>
    %32 = arith.mulf %31, %30 : vector<8x128xf32>
    %33 = math.sin %32 : vector<8x128xf32>
    %34 = math.cos %32 : vector<8x128xf32>
    %cst_14 = arith.constant 0.000000e+00 : f32
    %35 = vector.broadcast %cst_14 : f32 to vector<8x128xf32>
    %36 = arith.cmpf ogt, %4, %35 : vector<8x128xf32>
    %37 = arith.extui %36 : vector<8x128xi1> to vector<8x128xi32>
    %38 = arith.sitofp %37 : vector<8x128xi32> to vector<8x128xf32>
    %cst_15 = arith.constant 3.000000e-03 : f32
    %39 = vector.broadcast %cst_15 : f32 to vector<8x128xf32>
    %40 = arith.mulf %38, %39 : vector<8x128xf32>
    %cst_16 = arith.constant 1.000000e+00 : f32
    %41 = vector.broadcast %cst_16 : f32 to vector<8x128xf32>
    %42 = arith.subf %41, %38 : vector<8x128xf32>
    %cst_17 = arith.constant 0.0333333351 : f32
    %43 = vector.broadcast %cst_17 : f32 to vector<8x128xf32>
    %44 = arith.mulf %42, %43 : vector<8x128xf32>
    %45 = arith.addf %40, %44 : vector<8x128xf32>
    %cst_18 = arith.constant 1.000000e-01 : f32
    %46 = vector.broadcast %cst_18 : f32 to vector<8x128xf32>
    %47 = arith.mulf %38, %46 : vector<8x128xf32>
    %cst_19 = arith.constant 0.000000e+00 : f32
    %48 = vector.broadcast %cst_19 : f32 to vector<8x128xf32>
    %49 = arith.index_cast %arg0 : i32 to index
    %c0_20 = arith.constant 0 : index
    %50 = memref.load %arg2[%49, %c0_20] : memref<2x8xf32, #tpu.memory_space<smem>>
    %51 = vector.broadcast %50 : f32 to vector<8x128xf32>
    %52 = arith.mulf %33, %51 : vector<8x128xf32>
    %53 = arith.index_cast %arg0 : i32 to index
    %c0_21 = arith.constant 0 : index
    %54 = memref.load %arg3[%53, %c0_21] : memref<2x8xf32, #tpu.memory_space<smem>>
    %55 = vector.broadcast %54 : f32 to vector<8x128xf32>
    %56 = arith.mulf %34, %55 : vector<8x128xf32>
    %57 = arith.addf %52, %56 : vector<8x128xf32>
    %cst_22 = arith.constant 2.205000e+04 : f32
    %58 = vector.broadcast %cst_22 : f32 to vector<8x128xf32>
    %59 = arith.cmpf ogt, %4, %58 : vector<8x128xf32>
    %cst_23 = arith.constant 0.000000e+00 : f32
    %60 = vector.broadcast %cst_23 : f32 to vector<8x128xf32>
    %61 = arith.select %59, %60, %57 : vector<8x128xi1>, vector<8x128xf32>
    %62 = arith.addf %48, %61 : vector<8x128xf32>
    %63 = arith.mulf %33, %34 : vector<8x128xf32>
    %64 = arith.mulf %34, %33 : vector<8x128xf32>
    %65 = arith.addf %63, %64 : vector<8x128xf32>
    %66 = arith.mulf %34, %34 : vector<8x128xf32>
    %67 = arith.mulf %33, %33 : vector<8x128xf32>
    %68 = arith.subf %66, %67 : vector<8x128xf32>
    %69 = arith.index_cast %arg0 : i32 to index
    %c1 = arith.constant 1 : index
    %70 = memref.load %arg2[%69, %c1] : memref<2x8xf32, #tpu.memory_space<smem>>
    %71 = vector.broadcast %70 : f32 to vector<8x128xf32>
    %72 = arith.mulf %65, %71 : vector<8x128xf32>
    %73 = arith.index_cast %arg0 : i32 to index
    %c1_24 = arith.constant 1 : index
    %74 = memref.load %arg3[%73, %c1_24] : memref<2x8xf32, #tpu.memory_space<smem>>
    %75 = vector.broadcast %74 : f32 to vector<8x128xf32>
    %76 = arith.mulf %68, %75 : vector<8x128xf32>
    %77 = arith.addf %72, %76 : vector<8x128xf32>
    %cst_25 = arith.constant 1.102500e+04 : f32
    %78 = vector.broadcast %cst_25 : f32 to vector<8x128xf32>
    %79 = arith.cmpf ogt, %4, %78 : vector<8x128xf32>
    %cst_26 = arith.constant 0.000000e+00 : f32
    %80 = vector.broadcast %cst_26 : f32 to vector<8x128xf32>
    %81 = arith.select %79, %80, %77 : vector<8x128xi1>, vector<8x128xf32>
    %82 = arith.addf %62, %81 : vector<8x128xf32>
    %83 = arith.mulf %65, %34 : vector<8x128xf32>
    %84 = arith.mulf %68, %33 : vector<8x128xf32>
    %85 = arith.addf %83, %84 : vector<8x128xf32>
    %86 = arith.mulf %68, %34 : vector<8x128xf32>
    %87 = arith.mulf %65, %33 : vector<8x128xf32>
    %88 = arith.subf %86, %87 : vector<8x128xf32>
    %89 = arith.index_cast %arg0 : i32 to index
    %c2 = arith.constant 2 : index
    %90 = memref.load %arg2[%89, %c2] : memref<2x8xf32, #tpu.memory_space<smem>>
    %91 = vector.broadcast %90 : f32 to vector<8x128xf32>
    %92 = arith.mulf %85, %91 : vector<8x128xf32>
    %93 = arith.index_cast %arg0 : i32 to index
    %c2_27 = arith.constant 2 : index
    %94 = memref.load %arg3[%93, %c2_27] : memref<2x8xf32, #tpu.memory_space<smem>>
    %95 = vector.broadcast %94 : f32 to vector<8x128xf32>
    %96 = arith.mulf %88, %95 : vector<8x128xf32>
    %97 = arith.addf %92, %96 : vector<8x128xf32>
    %cst_28 = arith.constant 7.350000e+03 : f32
    %98 = vector.broadcast %cst_28 : f32 to vector<8x128xf32>
    %99 = arith.cmpf ogt, %4, %98 : vector<8x128xf32>
    %cst_29 = arith.constant 0.000000e+00 : f32
    %100 = vector.broadcast %cst_29 : f32 to vector<8x128xf32>
    %101 = arith.select %99, %100, %97 : vector<8x128xi1>, vector<8x128xf32>
    %102 = arith.addf %82, %101 : vector<8x128xf32>
    %103 = arith.mulf %85, %34 : vector<8x128xf32>
    %104 = arith.mulf %88, %33 : vector<8x128xf32>
    %105 = arith.addf %103, %104 : vector<8x128xf32>
    %106 = arith.mulf %88, %34 : vector<8x128xf32>
    %107 = arith.mulf %85, %33 : vector<8x128xf32>
    %108 = arith.subf %106, %107 : vector<8x128xf32>
    %109 = arith.index_cast %arg0 : i32 to index
    %c3 = arith.constant 3 : index
    %110 = memref.load %arg2[%109, %c3] : memref<2x8xf32, #tpu.memory_space<smem>>
    %111 = vector.broadcast %110 : f32 to vector<8x128xf32>
    %112 = arith.mulf %105, %111 : vector<8x128xf32>
    %113 = arith.index_cast %arg0 : i32 to index
    %c3_30 = arith.constant 3 : index
    %114 = memref.load %arg3[%113, %c3_30] : memref<2x8xf32, #tpu.memory_space<smem>>
    %115 = vector.broadcast %114 : f32 to vector<8x128xf32>
    %116 = arith.mulf %108, %115 : vector<8x128xf32>
    %117 = arith.addf %112, %116 : vector<8x128xf32>
    %cst_31 = arith.constant 5.512500e+03 : f32
    %118 = vector.broadcast %cst_31 : f32 to vector<8x128xf32>
    %119 = arith.cmpf ogt, %4, %118 : vector<8x128xf32>
    %cst_32 = arith.constant 0.000000e+00 : f32
    %120 = vector.broadcast %cst_32 : f32 to vector<8x128xf32>
    %121 = arith.select %119, %120, %117 : vector<8x128xi1>, vector<8x128xf32>
    %122 = arith.addf %102, %121 : vector<8x128xf32>
    %123 = arith.mulf %105, %34 : vector<8x128xf32>
    %124 = arith.mulf %108, %33 : vector<8x128xf32>
    %125 = arith.addf %123, %124 : vector<8x128xf32>
    %126 = arith.mulf %108, %34 : vector<8x128xf32>
    %127 = arith.mulf %105, %33 : vector<8x128xf32>
    %128 = arith.subf %126, %127 : vector<8x128xf32>
    %129 = arith.index_cast %arg0 : i32 to index
    %c4 = arith.constant 4 : index
    %130 = memref.load %arg2[%129, %c4] : memref<2x8xf32, #tpu.memory_space<smem>>
    %131 = vector.broadcast %130 : f32 to vector<8x128xf32>
    %132 = arith.mulf %125, %131 : vector<8x128xf32>
    %133 = arith.index_cast %arg0 : i32 to index
    %c4_33 = arith.constant 4 : index
    %134 = memref.load %arg3[%133, %c4_33] : memref<2x8xf32, #tpu.memory_space<smem>>
    %135 = vector.broadcast %134 : f32 to vector<8x128xf32>
    %136 = arith.mulf %128, %135 : vector<8x128xf32>
    %137 = arith.addf %132, %136 : vector<8x128xf32>
    %cst_34 = arith.constant 4.410000e+03 : f32
    %138 = vector.broadcast %cst_34 : f32 to vector<8x128xf32>
    %139 = arith.cmpf ogt, %4, %138 : vector<8x128xf32>
    %cst_35 = arith.constant 0.000000e+00 : f32
    %140 = vector.broadcast %cst_35 : f32 to vector<8x128xf32>
    %141 = arith.select %139, %140, %137 : vector<8x128xi1>, vector<8x128xf32>
    %142 = arith.addf %122, %141 : vector<8x128xf32>
    %143 = arith.mulf %125, %34 : vector<8x128xf32>
    %144 = arith.mulf %128, %33 : vector<8x128xf32>
    %145 = arith.addf %143, %144 : vector<8x128xf32>
    %146 = arith.mulf %128, %34 : vector<8x128xf32>
    %147 = arith.mulf %125, %33 : vector<8x128xf32>
    %148 = arith.subf %146, %147 : vector<8x128xf32>
    %149 = arith.index_cast %arg0 : i32 to index
    %c5 = arith.constant 5 : index
    %150 = memref.load %arg2[%149, %c5] : memref<2x8xf32, #tpu.memory_space<smem>>
    %151 = vector.broadcast %150 : f32 to vector<8x128xf32>
    %152 = arith.mulf %145, %151 : vector<8x128xf32>
    %153 = arith.index_cast %arg0 : i32 to index
    %c5_36 = arith.constant 5 : index
    %154 = memref.load %arg3[%153, %c5_36] : memref<2x8xf32, #tpu.memory_space<smem>>
    %155 = vector.broadcast %154 : f32 to vector<8x128xf32>
    %156 = arith.mulf %148, %155 : vector<8x128xf32>
    %157 = arith.addf %152, %156 : vector<8x128xf32>
    %cst_37 = arith.constant 3.675000e+03 : f32
    %158 = vector.broadcast %cst_37 : f32 to vector<8x128xf32>
    %159 = arith.cmpf ogt, %4, %158 : vector<8x128xf32>
    %cst_38 = arith.constant 0.000000e+00 : f32
    %160 = vector.broadcast %cst_38 : f32 to vector<8x128xf32>
    %161 = arith.select %159, %160, %157 : vector<8x128xi1>, vector<8x128xf32>
    %162 = arith.addf %142, %161 : vector<8x128xf32>
    %163 = arith.mulf %145, %34 : vector<8x128xf32>
    %164 = arith.mulf %148, %33 : vector<8x128xf32>
    %165 = arith.addf %163, %164 : vector<8x128xf32>
    %166 = arith.mulf %148, %34 : vector<8x128xf32>
    %167 = arith.mulf %145, %33 : vector<8x128xf32>
    %168 = arith.subf %166, %167 : vector<8x128xf32>
    %169 = arith.index_cast %arg0 : i32 to index
    %c6 = arith.constant 6 : index
    %170 = memref.load %arg2[%169, %c6] : memref<2x8xf32, #tpu.memory_space<smem>>
    %171 = vector.broadcast %170 : f32 to vector<8x128xf32>
    %172 = arith.mulf %165, %171 : vector<8x128xf32>
    %173 = arith.index_cast %arg0 : i32 to index
    %c6_39 = arith.constant 6 : index
    %174 = memref.load %arg3[%173, %c6_39] : memref<2x8xf32, #tpu.memory_space<smem>>
    %175 = vector.broadcast %174 : f32 to vector<8x128xf32>
    %176 = arith.mulf %168, %175 : vector<8x128xf32>
    %177 = arith.addf %172, %176 : vector<8x128xf32>
    %cst_40 = arith.constant 3.150000e+03 : f32
    %178 = vector.broadcast %cst_40 : f32 to vector<8x128xf32>
    %179 = arith.cmpf ogt, %4, %178 : vector<8x128xf32>
    %cst_41 = arith.constant 0.000000e+00 : f32
    %180 = vector.broadcast %cst_41 : f32 to vector<8x128xf32>
    %181 = arith.select %179, %180, %177 : vector<8x128xi1>, vector<8x128xf32>
    %182 = arith.addf %162, %181 : vector<8x128xf32>
    %183 = arith.mulf %165, %34 : vector<8x128xf32>
    %184 = arith.mulf %168, %33 : vector<8x128xf32>
    %185 = arith.addf %183, %184 : vector<8x128xf32>
    %186 = arith.mulf %168, %34 : vector<8x128xf32>
    %187 = arith.mulf %165, %33 : vector<8x128xf32>
    %188 = arith.subf %186, %187 : vector<8x128xf32>
    %189 = arith.index_cast %arg0 : i32 to index
    %c7 = arith.constant 7 : index
    %190 = memref.load %arg2[%189, %c7] : memref<2x8xf32, #tpu.memory_space<smem>>
    %191 = vector.broadcast %190 : f32 to vector<8x128xf32>
    %192 = arith.mulf %185, %191 : vector<8x128xf32>
    %193 = arith.index_cast %arg0 : i32 to index
    %c7_42 = arith.constant 7 : index
    %194 = memref.load %arg3[%193, %c7_42] : memref<2x8xf32, #tpu.memory_space<smem>>
    %195 = vector.broadcast %194 : f32 to vector<8x128xf32>
    %196 = arith.mulf %188, %195 : vector<8x128xf32>
    %197 = arith.addf %192, %196 : vector<8x128xf32>
    %cst_43 = arith.constant 2.756250e+03 : f32
    %198 = vector.broadcast %cst_43 : f32 to vector<8x128xf32>
    %199 = arith.cmpf ogt, %4, %198 : vector<8x128xf32>
    %cst_44 = arith.constant 0.000000e+00 : f32
    %200 = vector.broadcast %cst_44 : f32 to vector<8x128xf32>
    %201 = arith.select %199, %200, %197 : vector<8x128xi1>, vector<8x128xf32>
    %202 = arith.addf %182, %201 : vector<8x128xf32>
    %203 = arith.mulf %202, %47 : vector<8x128xf32>
    %c0_45 = arith.constant 0 : index
    %c0_46 = arith.constant 0 : index
    %c0_47 = arith.constant 0 : index
    %204 = vector.load %arg6[%c0_45, %c0_46, %c0_47] : memref<1x8x128xf32, #tpu.memory_space<vmem>>, vector<1x8x128xf32>
    %205 = vector.shape_cast %204 : vector<1x8x128xf32> to vector<8x128xf32>
    %206 = arith.mulf %45, %205 : vector<8x128xf32>
    %207 = arith.addf %203, %206 : vector<8x128xf32>
    %c0_48 = arith.constant 0 : index
    %208 = memref.load %arg4[%c0_48] : memref<1xf32, #tpu.memory_space<smem>>
    %209 = vector.broadcast %208 : f32 to vector<8x128xf32>
    %210 = arith.addf %207, %209 : vector<8x128xf32>
    %211 = math.tanh %210 : vector<8x128xf32>
    %c0_49 = arith.constant 0 : index
    %c0_50 = arith.constant 0 : index
    %c0_51 = arith.constant 0 : index
    %212 = vector.load %arg7[%c0_49, %c0_50, %c0_51] : memref<1x8x128xf32, #tpu.memory_space<vmem>>, vector<1x8x128xf32>
    %213 = vector.shape_cast %212 : vector<1x8x128xf32> to vector<8x128xf32>
    %214 = vector.shape_cast %211 : vector<8x128xf32> to vector<1x8x128xf32>
    tpu.vector_store %arg7[%c0_49, %c0_50, %c0_51], %214 {strides = array<i32>} : memref<1x8x128xf32, #tpu.memory_space<vmem>>, vector<1x8x128xf32>,
    return
  }
  func.func @transform_0(%arg0: i32, %arg1: i32) -> (i32, i32) {
    %c0_i32 = arith.constant 0 : i32
    %c0_i32_0 = arith.constant 0 : i32
    %c0_i32_1 = arith.constant 0 : i32
    return %c0_i32, %c0_i32_0 : i32, i32
  }
  func.func @transform_1(%arg0: i32, %arg1: i32) -> (i32, i32) {
    %c0_i32 = arith.constant 0 : i32
    %c0_i32_0 = arith.constant 0 : i32
    %c0_i32_1 = arith.constant 0 : i32
    return %c0_i32, %c0_i32_0 : i32, i32
  }
  func.func @transform_2(%arg0: i32, %arg1: i32) -> i32 {
    %c0_i32 = arith.constant 0 : i32
    %c0_i32_0 = arith.constant 0 : i32
    return %c0_i32 : i32
  }
  func.func @transform_3(%arg0: i32, %arg1: i32) -> (i32, i32, i32) {
    %c0_i32 = arith.constant 0 : i32
    %c0_i32_0 = arith.constant 0 : i32
    return %arg0, %arg1, %c0_i32 : i32, i32, i32
  }
  func.func @transform_4(%arg0: i32, %arg1: i32) -> (i32, i32, i32) {
    %c0_i32 = arith.constant 0 : i32
    %c0_i32_0 = arith.constant 0 : i32
    return %arg0, %arg1, %c0_i32 : i32, i32, i32
  }
  func.func @transform_5(%arg0: i32, %arg1: i32) -> (i32, i32, i32) {
    %c0_i32 = arith.constant 0 : i32
    %c0_i32_0 = arith.constant 0 : i32
    return %arg0, %arg1, %c0_i32 : i32, i32, i32
  }
}

</mosaic_0001>

<bundles_post_ra>
// kernel: tpu_custom_call.1
= control target key start
LH: loop header
LB: loop body
LE: loop exit
PB: predicated region body
PF: predicated region fallthrough
CT: control target
= control target key end

     0   :  { %s2666_s0 = inlined_call_operand.vmem [shape: f32[2,8], index: 0, kind: input, shape index: {}]   ;;  %s2667_s1 = inlined_call_operand.hbm [shape: f32[2,8], index: 1, kind: input, shape index: {}]   ;;  %s2668_s2 = inlined_call_operand.<no memory space> [shape: f32[1], index: 2, kind: input, shape index: {}]   ;;  %s2669_s3 = inlined_call_operand.hbm [shape: f32[2,32,128], index: 3, kind: input, shape index: {}]   ;;  %s2670_s4 = inlined_call_operand.hbm [shape: f32[2,32,128], index: 4, kind: input, shape index: {}]   ;;  %s2671_s5 = inlined_call_operand.hbm [shape: f32[2,32,128], index: 5, kind: output, shape index: {}]  }
   0x1   :  { %2677 = sst [smem:[#allocation25_spill]] %s2666_s0 }
   0x2   :  { %2678 = sst [smem:[#allocation26_spill]] %s2667_s1 }
   0x3   :  { %2679 = sst [smem:[#allocation27_spill]] %s2671_s5 }
   0x4   :  { %10 = sst [smem:[#allocation5]] %s2668_s2 }
   0x5   :  { %11 = vsyncpa [#allocation10], 0 }
   0x6   :  { %12 = vsyncpa [#allocation9], 0 }
   0x7   :  { %13 = vsyncpa [#allocation7], 0 }
   0x8   :  { %15 = vsyncpa [#allocation7 + $0x1], 0 }
   0x9   :  { %16 = vsyncpa [#allocation14], 0 }
   0xa   :  { %18 = vsyncpa [#allocation14 + $0x1], 0 }
   0xb   :  { %19 = vsyncpa [#allocation8], 0 }
   0xc   :  { %21 = vsyncpa [#allocation8 + $0x1], 0  ;;  %s1985_s20 = smov 0   ;;  %s1987_s21 = smov 0  }
   0xd   :  { %s1989_s22 = smov 0   ;;  %s1991_s23 = smov 0  }
   0xe   :  { %s1993_s24 = smov 0   ;;  %s1995_s25 = smov 0  }
   0xf   :  { %s1997_s2 = smov 0   ;;  %s1999_s26 = smov 0  }
  0x10 LB: > { %2680 = sst [smem:[#allocation21_spill]] %s1910_s20  ;;  %s1571_s27 = sadd.s32 4294967295, %s1938_s26   ;;  %s1938_s26 = sphi %s1999_s26, %s27_s26   ;;  %s1934_s2 = sphi %s1997_s2, %s2704_s2   ;;  %s1930_s25 = sphi %s1995_s25, %s2703_s25   ;;  %s1926_s24 = sphi %s1993_s24, %s2702_s24   ;;  %s1922_s23 = sphi %s1991_s23, %s2701_s23   ;;  %s1918_s22 = sphi %s1989_s22, %s2700_s22   ;;  %s1914_s21 = sphi %s1987_s21, %s2699_s21   ;;  %s1910_s20 = sphi %s1985_s20, %s2698_s20  }
  0x11   : > { %s1572_s28 = sadd.s32 4294967294, %s1938_s26   ;;  %p124_p0 = scmp.ne.s32.totalorder %s1914_s21, %s1910_s20 }
  0x12   : > { %p2029_p1 = scmp.eq.s32.totalorder %s1571_s27, 0  ;;  %p2033_p2 = scmp.eq.s32.totalorder %s1571_s27, 7 }
  0x13   : > { %p184_p3 = scmp.eq.s32.totalorder %s1572_s28, 7  ;;  %p1573_p5 = scmp.ge.s32.totalorder %s1938_s26, 1 }
  0x14   : > { %p2039_p4 = por %p2029_p1, %p124_p0  ;;  %p191_p7 = scmp.lt.s32.totalorder %s1938_s26, 9 }
  0x15   : > { %p2044_p6 = por %p184_p3, %p124_p0  ;;  %s2686_s0 = sld [smem:[#allocation25_spill]] }
  0x16   : > { %p2052_p8 = pnand %p1573_p5, %p191_p7  ;;  %s2688_s1 = sld [smem:[#allocation26_spill]] }
  0x17   : > { %s2684_s7 = scalar_select %p2044_p6, 1, 0 }
  0x18   : > { %p1634_p9 = pneg %p2052_p8  ;;  %s1940_s15 = smov [#allocation6]  }
  0x19   : > { %2685 = sst [smem:[#allocation22_spill]] %s2684_s7  ;;  %s1941_s16 = smov [#allocation11]  }
  0x1a   : > { %p1635_p10 = pnand %p1634_p9, %p2029_p1  ;;  %s36_s17 = sadd.s32 1, %s1930_s25 }
  0x1b   : > { %s203_s10 = sshll.u32 %s2686_s0, 4  ;;  %s39_s18 = sadd.s32 1, %s1934_s2  ;;  %s204_s10 = int_to_ptr.vmem [resolvable:$true] %s203_s10 }
  0x1c   : > { %s213_s14 = sshll.u32 %s2688_s1, 4  ;;  %p37_p11 = scmp.ge.s32.totalorder %s36_s17, 4  ;;  %s214_s14 = int_to_ptr.hbm [resolvable:$true] %s213_s14 }
  0x1d   : > { %1637 = dma.vmem_to_smem (!%p1635_p10), %s204_s10, 32, %s1940_s15, [#allocation10]  }
  0x1e   : > { %1640 = dma.hbm_to_smem (!%p1635_p10), %s214_s14, 32, %s1941_s16, [#allocation9]  }
  0x1f   : > { %s111_s19 = sadd.s32 1, %s1918_s22  ;;  %p118_p12 = scmp.ne.s32.totalorder %s1918_s22, %s1914_s21 }
  0x20   : > { %p119_p13 = scmp.eq.s32.totalorder %s1938_s26, 0  ;;  %s2706_s17 = smov (%p37_p11, %s36_s17), 0 }
  0x21   : > { %2689 = sst [smem:[#allocation23_spill]] %s2706_s17  ;;  %s2708_s18 = smov (!%p37_p11, %s39_s18), %s1934_s2 }
  0x22   : > { %s107_s27 = ssub.s32 %s1930_s25, %s2706_s17  ;;  %p2074_p0 = por %p119_p13, %p118_p12 }
  0x23   : > { %p41_p3 = scmp.ge.s32.totalorder %s2708_s18, 2  ;;  %p2080_p5 = por %p2033_p2, %p118_p12 }
  0x24   : > { %p1654_p7 = scmp.lt.s32.totalorder %s1938_s26, 8  ;;  %s227_s9 = sand.u32 1, %s1918_s22  }
  0x25   : > { %s2710_s18 = smov (%p41_p3, %s2708_s18), 0  ;;  %s1577_s10 = sshll.u32 %s227_s9, 3 }
  0x26   : > { %2692 = sst [smem:[#allocation24_spill]] %s2710_s18  ;;  %s106_s12 = ssub.s32 %s1934_s2, %s2710_s18 }
  0x27   : > { %s108_s13 = sor.u32 %s107_s27, %s106_s12  ;;  %s1578_s14 = sshll.u32 %s1934_s2, 2 }
  0x28   : > { %p109_p9 = scmp.eq.s32.totalorder %s108_s13, 0  ;;  %s235_s15 = sadd.s32 %s1930_s25, %s1578_s14 }
  0x29   : > { %s1579_s16 = sshll.u32 %s235_s15, 3  ;;  %s231_s0 = scalar_lea.vmem [#allocation12], %s1577_s10 }
  0x2a   : > { %s241_s30 = sshll.u32 %s231_s0, 4  ;;  %s237_s20 = scalar_lea.hbm %s2669_s3, %s1579_s16  ;;  %s242_s30 = int_to_ptr.vmem [resolvable:$true] %s241_s30 }
  0x2b   : > { %s2093_s1 = scalar_select %p109_p9, %s1918_s22, %s111_s19  }
  0x2c   : > { %s239_s5 = sshll.u32 %s237_s20, 4  ;;  %p1642_p2 = pnand %p1654_p7, %p2074_p0  ;;  %s240_s5 = int_to_ptr.hbm [resolvable:$true] %s239_s5 }
  0x2d   : > { %s228_s18 = scalar_lea.sflag [#allocation7], %s227_s9  ;;  %s258_s13 = scalar_lea.hbm %s2670_s4, %s1579_s16 }
  0x2e   : > { %1644 = dma.hbm_to_vmem [thread:$0]  (!%p1642_p2), %s240_s5, 128, %s242_s30, %s228_s18  }
  0x2f   : > { %s252_s14 = scalar_lea.vmem [#allocation13], %s1577_s10  ;;  %s260_s19 = sshll.u32 %s258_s13, 4  ;;  %s261_s19 = int_to_ptr.hbm [resolvable:$true] %s260_s19 }
  0x30   : > { %s262_s0 = sshll.u32 %s252_s14, 4  ;;  %s249_s15 = scalar_lea.sflag [#allocation14], %s227_s9  ;;  %s263_s0 = int_to_ptr.vmem [resolvable:$true] %s262_s0 }
  0x31   : > { %1647 = dma.hbm_to_vmem [thread:$0]  (!%p1642_p2), %s261_s19, 128, %s263_s0, %s249_s15  }
  0x32   : > { %271 = sbr.rel (%p2052_p8) target bundleno = 861 (0x35d), region = 40 }
  0x37   : > { %1889 = dma.done.wait (%p2029_p1), [#allocation10], 32  }
  0x38   : > { %1891 = vsyncadd (%p2029_p1), [#allocation10], 4294967264 }
  0x39   : > { %1893 = dma.done.wait (%p2029_p1), [#allocation9], 32  }
  0x3a   : > { %1895 = vsyncadd (%p2029_p1), [#allocation9], 4294967264  ;;  %s2116_s5 = sand.u32 1, %s1914_s21  }
  0x3b   : > { %s2119_s20 = sshll.u32 %s2116_s5, 3  ;;  %s284_s7 = scalar_lea.sflag [#allocation7], %s2116_s5 }
  0x3c   : > { %s287_s11 = scalar_lea.vmem [#allocation12], %s2119_s20 }
  0x3d   : > { %1897 = dma.done.wait (%p2039_p4), %s284_s7, 128  }
  0x3e   : > { %1899 = vsyncadd (%p2039_p4), %s284_s7, 4294967168  ;;  %s294_s29 = scalar_lea.sflag [#allocation14], %s2116_s5  ;;  %s297_s17 = scalar_lea.vmem [#allocation13], %s2119_s20 }
  0x3f   : > { %1901 = dma.done.wait (%p2039_p4), %s294_s29, 128  }
  0x40   : > { %1903 = vsyncadd (%p2039_p4), %s294_s29, 4294967168 }
  0x41   : > { %303 = sfence }
  0x42   : > { %s330_s18 = scalar_lea.vmem [#allocation15], %s2119_s20  ;;  %p1589_p1 = scmp.ne.s32.totalorder %s1922_s23, 0 }
  0x44   : > { %334 = sbr.rel (%p1589_p1) target bundleno = 97 (0x61), region = 60 }
  0x49   : > { %v335_v0 = vlaneseq  ;;  %vm423_vm0 = vcmask 0   ;;  %v1942_v1 = vmov 0.0  }
  0x4a   : > { %424 = vst.msk [vmem:[#allocation4] sm:$0x1] %vm423_vm0, %v1942_v1 }
  0x4b   : > { %v2136_v2 = vshrl.u32 %v335_v0, 7  ;;  %v2138_v3 = vand.u32 127, %v335_v0 }
  0x4d   : > { %vm354_vm1 = vcmp.le.s32.totalorder %v2136_v2, %v2138_v3  ;;  %v337_v4 = vadd.s32 8, %v2136_v2  ;;  %v338_v5 = vadd.s32 16, %v2136_v2  ;;  %v339_v6 = vadd.s32 24, %v2136_v2 }
  0x4e   : > { %v1590_v7 = vsel %vm354_vm1, 1.0, %v1942_v1  ;;  %v340_v8 = vadd.s32 32, %v2136_v2  ;;  %v341_v9 = vadd.s32 40, %v2136_v2  ;;  %v342_v10 = vadd.s32 48, %v2136_v2 }
  0x4f   : > { %402 = vst [vmem:[#allocation2 + $0x30] sm:$0xff] %v1590_v7  ;;  %vm355_vm2 = vcmp.le.s32.totalorder %v337_v4, %v2138_v3  ;;  %vm356_vm3 = vcmp.le.s32.totalorder %v338_v5, %v2138_v3  ;;  %vm357_vm4 = vcmp.le.s32.totalorder %v339_v6, %v2138_v3  ;;  %v343_v11 = vadd.s32 56, %v2136_v2 }
  0x50   : > { %v1591_v12 = vsel %vm355_vm2, 1.0, %v1942_v1  ;;  %v1592_v13 = vsel %vm356_vm3, 1.0, %v1942_v1  ;;  %v1593_v14 = vsel %vm357_vm4, 1.0, %v1942_v1  ;;  %vm358_vm5 = vcmp.le.s32.totalorder %v340_v8, %v2138_v3 }
  0x51   : > { %403 = vst [vmem:[#allocation2] sm:$0xff] %v1591_v12  ;;  %v1594_v15 = vsel %vm358_vm5, 1.0, %v1942_v1  ;;  %vm359_vm6 = vcmp.le.s32.totalorder %v341_v9, %v2138_v3  ;;  %vm360_vm7 = vcmp.le.s32.totalorder %v342_v10, %v2138_v3  ;;  %vm361_vm8 = vcmp.le.s32.totalorder %v343_v11, %v2138_v3 }
  0x52   : > { %404 = vst [vmem:[#allocation2 + $0x58] sm:$0xff] %v1592_v13  ;;  %v1595_v16 = vsel %vm359_vm6, 1.0, %v1942_v1  ;;  %v1596_v17 = vsel %vm360_vm7, 1.0, %v1942_v1  ;;  %v1597_v18 = vsel %vm361_vm8, 1.0, %v1942_v1  ;;  %v344_v19 = vadd.s32 64, %v2136_v2 }
  0x53   : > { %405 = vst [vmem:[#allocation2 + $0x18] sm:$0xff] %v1593_v14  ;;  %v345_v20 = vadd.s32 72, %v2136_v2  ;;  %v346_v21 = vadd.s32 80, %v2136_v2  ;;  %v347_v22 = vadd.s32 88, %v2136_v2  ;;  %v348_v23 = vadd.s32 96, %v2136_v2 }
  0x54   : > { %406 = vst [vmem:[#allocation2 + $0x50] sm:$0xff] %v1594_v15  ;;  %vm362_vm9 = vcmp.le.s32.totalorder %v344_v19, %v2138_v3  ;;  %v349_v24 = vadd.s32 104, %v2136_v2  ;;  %v350_v25 = vadd.s32 112, %v2136_v2  ;;  %v351_v26 = vadd.s32 120, %v2136_v2 }
  0x55   : > { %407 = vst [vmem:[#allocation2 + $0x68] sm:$0xff] %v1595_v16  ;;  %v1598_v27 = vsel %vm362_vm9, 1.0, %v1942_v1  ;;  %vm363_vm10 = vcmp.le.s32.totalorder %v345_v20, %v2138_v3  ;;  %vm364_vm11 = vcmp.le.s32.totalorder %v346_v21, %v2138_v3  ;;  %vm365_vm12 = vcmp.le.s32.totalorder %v347_v22, %v2138_v3 }
  0x56   : > { %408 = vst [vmem:[#allocation2 + $0x8] sm:$0xff] %v1596_v17  ;;  %v1599_v28 = vsel %vm363_vm10, 1.0, %v1942_v1  ;;  %vm366_vm13 = vcmp.le.s32.totalorder %v348_v23, %v2138_v3  ;;  %v1600_v29 = vsel %vm364_vm11, 1.0, %v1942_v1  ;;  %vm367_vm14 = vcmp.le.s32.totalorder %v349_v24, %v2138_v3 }
  0x57   : > { %409 = vst [vmem:[#allocation2 + $0x48] sm:$0xff] %v1597_v18  ;;  %v1601_v30 = vsel %vm365_vm12, 1.0, %v1942_v1  ;;  %vm368_vm15 = vcmp.le.s32.totalorder %v350_v25, %v2138_v3  ;;  %v1602_v31 = vsel %vm366_vm13, 1.0, %v1942_v1  ;;  %vm369_vm0 = vcmp.le.s32.totalorder %v351_v26, %v2138_v3 }
  0x58   : > { %410 = vst [vmem:[#allocation2 + $0x40] sm:$0xff] %v1598_v27  ;;  %v1603_v32 = vsel %vm367_vm14, 1.0, %v1942_v1  ;;  %vm418_vm1 = vcmp.lt.s32.totalorder %v2138_v3, %v2136_v2  ;;  %v1604_v33 = vsel %vm368_vm15, 1.0, %v1942_v1  ;;  %v1605_v34 = vsel %vm369_vm0, 1.0, %v1942_v1 }
  0x59   : > { %411 = vst [vmem:[#allocation2 + $0x20] sm:$0xff] %v1599_v28  ;;  %v1606_v35 = vsel %vm418_vm1, 1.0, %v1942_v1  ;;  %vm421_vm2 = vcmask 64512  }
  0x5a   : > { %412 = vst [vmem:[#allocation2 + $0x10] sm:$0xff] %v1600_v29 }
  0x5b   : > { %413 = vst [vmem:[#allocation2 + $0x38] sm:$0xff] %v1601_v30 }
  0x5c   : > { %414 = vst [vmem:[#allocation2 + $0x60] sm:$0xff] %v1602_v31 }
  0x5d   : > { %415 = vst [vmem:[#allocation2 + $0x70] sm:$0xff] %v1603_v32 }
  0x5e   : > { %416 = vst [vmem:[#allocation2 + $0x78] sm:$0xff] %v1604_v33 }
  0x5f   : > { %417 = vst [vmem:[#allocation2 + $0x28] sm:$0xff] %v1605_v34 }
  0x60   : > { %422 = vst.msk [vmem:[#allocation3] sm:$0xff] %vm421_vm2, %v1606_v35 }
  0x61 PF: > { %v439_v44 = vld [vmem:[#allocation2 + $0x10] sm:$0xff]  ;;  %v438_v48 = vld [vmem:[#allocation2 + $0x20] sm:$0xff]  ;;  %v436_v54 = vld [vmem:[#allocation2 + $0x48] sm:$0xff]  ;;  %s1943_s6 = smov 1   ;;  %vm793_vm3 = vcmask 64512   ;;  %vm953_vm4 = vcmask 7175  }
  0x62   : > { %v440_v43 = vld [vmem:[#allocation2 + $0x38] sm:$0xff]  ;;  %v2201_v47 = vand.u32 4294901760, %v439_v44  ;;  %v437_v49 = vld [vmem:[#allocation2 + $0x40] sm:$0xff]  ;;  %v2213_v53 = vand.u32 4294901760, %v438_v48  ;;  %v435_v62 = vld [vmem:[#allocation2 + $0x8] sm:$0xff]  ;;  %v2233_v0 = vand.u32 4294901760, %v436_v54 }
  0x63   : > { %v441_v42 = vld [vmem:[#allocation2 + $0x60] sm:$0xff]  ;;  %v2199_v46 = vand.u32 4294901760, %v440_v43  ;;  %v2229_v61 = vand.u32 4294901760, %v437_v49  ;;  %v2252_v7 = vand.u32 4294901760, %v435_v62  ;;  %v434_v8 = vld [vmem:[#allocation2 + $0x68] sm:$0xff]  ;;  %v433_v13 = vld [vmem:[#allocation2 + $0x50] sm:$0xff] }
  0x64   : > { %v442_v38 = vld [vmem:[#allocation2 + $0x70] sm:$0xff]  ;;  %v2197_v45 = vand.u32 4294901760, %v441_v42  ;;  %v2223_v57 = vsub.f32 %v439_v44, %v2201_v47  ;;  %v2236_v1 = vsub.f32 %v438_v48, %v2213_v53  ;;  %v2269_v17 = vand.u32 4294901760, %v434_v8  ;;  %v432_v19 = vld [vmem:[#allocation2 + $0x18] sm:$0xff]  ;;  %v430_v32 = vld [vmem:[#allocation2] sm:$0xff]  ;;  %s2496_s28 = sshll.u32 %s1926_s24, 7 }
  0x65   : > { %v443_v37 = vld [vmem:[#allocation2 + $0x78] sm:$0xff]  ;;  %v2195_v41 = vand.u32 4294901760, %v442_v38  ;;  %v2220_v56 = vsub.f32 %v440_v43, %v2199_v46  ;;  %v2260_v12 = vsub.f32 %v437_v49, %v2229_v61  ;;  %v2272_v18 = vsub.f32 %v436_v54, %v2233_v0  ;;  %s1297_s9 = sadd.s32 1, %s2496_s28  ;;  %s2508_s10 = sld [smem:[#allocation6 + %s2496_s28]] }
  0x66   : > { %v444_v36 = vld [vmem:[#allocation2 + $0x28] sm:$0xff]  ;;  %v2193_v40 = vand.u32 4294901760, %v443_v37  ;;  %v2217_v55 = vsub.f32 %v441_v42, %v2197_v45  ;;  %v518_v6 = vand.u32 4294901760, %v2223_v57  ;;  %v524_v14 = vand.u32 4294901760, %v2236_v1  ;;  %v431_v27 = vld [vmem:[#allocation2 + $0x58] sm:$0xff]  ;;  %s2513_s16 = sld [smem:[#allocation11 + %s2496_s28]] }
  0x67   : > { %v2191_v39 = vand.u32 4294901760, %v444_v36  ;;  %v2211_v52 = vsub.f32 %v442_v38, %v2195_v41  ;;  %v512_v5 = vand.u32 4294901760, %v2220_v56  ;;  %v2274_v20 = vand.u32 4294901760, %v433_v13  ;;  %v2305_v33 = vld [vmem:[%s287_s11] sm:$0xff]  ;;  %s1314_s30 = sadd.s32 2, %s2496_s28  ;;  %s2516_s27 = sld [smem:[#allocation6 + %s1297_s9]] }
  0x68   : > { %v2208_v51 = vsub.f32 %v443_v37, %v2193_v40  ;;  %v506_v63 = vand.u32 4294901760, %v2217_v55  ;;  %v519_v22 = vsub.f32 %v2223_v57, %v518_v6  ;;  %v530_v23 = vand.u32 4294901760, %v2260_v12  ;;  %v429_v38 = vld [vmem:[#allocation2 + $0x30] sm:$0xff]  ;;  %s2518_s12 = sld [smem:[#allocation11 + %s1297_s9]]  ;;  %s1331_s13 = sadd.s32 3, %s2496_s28 }
  0x69   : > { %446 = vmatpush.msra.mxu0 %v2191_v39  ;;  %v2205_v50 = vsub.f32 %v444_v36, %v2191_v39  ;;  %642 = vmatpush.msra.mxu3 %v2191_v39  ;;  %v500_v60 = vand.u32 4294901760, %v2211_v52  ;;  %v513_v16 = vsub.f32 %v2220_v56, %v512_v5  ;;  %v2284_v24 = vsub.f32 %v435_v62, %v2252_v7  ;;  %s2525_s14 = sld [smem:[#allocation6 + %s1314_s30]]  ;;  %s1348_s15 = sadd.s32 4, %s2496_s28 }
  0x6a   : > { %v494_v59 = vand.u32 4294901760, %v2208_v51  ;;  %v507_v11 = vsub.f32 %v2217_v55, %v506_v63  ;;  %v525_v25 = vsub.f32 %v2236_v1, %v524_v14  ;;  %v2289_v26 = vand.u32 4294901760, %v432_v19  ;;  %s2527_s0 = sld [smem:[#allocation11 + %s1314_s30]]  ;;  %s1365_s11 = sadd.s32 5, %s2496_s28 }
  0x6b   : > { %448 = vmatpush.msra.mxu0 %v2193_v40  ;;  %v488_v58 = vand.u32 4294901760, %v2205_v50  ;;  %589 = vmatpush.msra.mxu2 %v2205_v50  ;;  %v501_v4 = vsub.f32 %v2211_v52, %v500_v60  ;;  %v514_v28 = vand.u32 4294901760, %v513_v16  ;;  %v536_v29 = vand.u32 4294901760, %v2272_v18  ;;  %s2529_s19 = sld [smem:[#allocation6 + %s1331_s13]] }
  0x6c   : > { %644 = vmatpush.msra.mxu3 %v2193_v40  ;;  %v495_v3 = vsub.f32 %v2208_v51, %v494_v59  ;;  %v508_v21 = vand.u32 4294901760, %v507_v11  ;;  %v2296_v30 = vsub.f32 %v434_v8, %v2269_v17  ;;  %v2299_v31 = vsub.f32 %v433_v13, %v2274_v20  ;;  %s2532_s7 = sld [smem:[#allocation11 + %s1331_s13]] }
  0x6d   : > { %450 = vmatpush.msra.mxu0 %v2195_v41  ;;  %v489_v2 = vsub.f32 %v2205_v50, %v488_v58  ;;  %592 = vmatpush.msra.mxu2 %v2208_v51  ;;  %v502_v15 = vand.u32 4294901760, %v501_v4  ;;  %v520_v34 = vand.u32 4294901760, %v519_v22  ;;  %v531_v35 = vsub.f32 %v2260_v12, %v530_v23  ;;  %s2540_s29 = sld [smem:[#allocation6 + %s1348_s15]] }
  0x6e   : > { %646 = vmatpush.msra.mxu3 %v2195_v41  ;;  %v496_v10 = vand.u32 4294901760, %v495_v3  ;;  %v542_v36 = vand.u32 4294901760, %v2284_v24  ;;  %v2312_v37 = vand.u32 4294901760, %v431_v27  ;;  %v526_v42 = vand.u32 4294901760, %v525_v25  ;;  %s2548_s9 = sld [smem:[#allocation6 + %s1365_s11]] }
  0x6f   : > { %v490_v9 = vand.u32 4294901760, %v489_v2  ;;  %452 = vmatpush.msra.mxu0 %v2197_v45  ;;  %595 = vmatpush.msra.mxu2 %v2211_v52  ;;  %v2315_v43 = vsub.f32 %v432_v19, %v2289_v26  ;;  %v537_v44 = vsub.f32 %v2272_v18, %v536_v29  ;;  %v548_v48 = vand.u32 4294901760, %v2296_v30  ;;  %s2555_s30 = sld [smem:[#allocation11 + %s1365_s11]] }
  0x70   : > { %648 = vmatpush.msra.mxu3 %v2197_v45  ;;  %v2324_v49 = vand.u32 4294901760, %v430_v32  ;;  %v426_v54 = vmul.f32 2.2675737e-05, %v2305_v33  ;;  %v554_v62 = vand.u32 4294901760, %v2299_v31  ;;  %v2328_v2 = vand.u32 4294901760, %v429_v38 }
  0x71   : > { %491 = vmatpush.msra.mxu1 %v490_v9  ;;  %454 = vmatpush.msra.mxu0 %v2199_v46  ;;  %v532_v3 = vand.u32 4294901760, %v531_v35  ;;  %v543_v4 = vsub.f32 %v2284_v24, %v542_v36  ;;  %v2337_v8 = vsub.f32 %v431_v27, %v2312_v37  ;;  %v538_v11 = vand.u32 4294901760, %v537_v44 }
  0x72   : > { %598 = vmatpush.msra.mxu2 %v2217_v55  ;;  %650 = vmatpush.msra.mxu3 %v2199_v46  ;;  %v427_v9 = vfloor.f32 %v426_v54  ;;  %v549_v13 = vsub.f32 %v2296_v30, %v548_v48  ;;  %v555_v19 = vsub.f32 %v2299_v31, %v554_v62  ;;  %v2357_v25 = vsub.f32 %v429_v38, %v2328_v2 }
  0x73   : > { %497 = vmatpush.msra.mxu1 %v496_v10  ;;  %456 = vmatpush.msra.mxu0 %v2201_v47  ;;  %v560_v10 = vand.u32 4294901760, %v2315_v43  ;;  %v566_v22 = vand.u32 4294901760, %v2337_v8 }
  0x74   : > { %601 = vmatpush.msra.mxu2 %v2220_v56  ;;  %652 = vmatpush.msra.mxu3 %v2201_v47  ;;  %v428_v16 = vsub.f32 %v426_v54, %v427_v9  ;;  %v556_v38 = vand.u32 4294901760, %v555_v19  ;;  %v578_v44 = vand.u32 4294901760, %v2357_v25 }
  0x75   : > { %503 = vmatpush.msra.mxu1 %v502_v15  ;;  %458 = vmatpush.msra.mxu0 %v2213_v53  ;;  %v2347_v15 = vsub.f32 %v430_v32, %v2324_v49  ;;  %v561_v32 = vsub.f32 %v2315_v43, %v560_v10 }
  0x76   : > { %604 = vmatpush.msra.mxu2 %v2223_v57  ;;  %654 = vmatpush.msra.mxu3 %v2213_v53  ;;  %v2359_v27 = vand.u32 4294901760, %v428_v16 }
  0x77   : > { %509 = vmatpush.msra.mxu1 %v508_v21  ;;  %460 = vmatpush.msra.mxu0 %v2229_v61  ;;  %v544_v21 = vand.u32 4294901760, %v543_v4 }
  0x78   : > { %607 = vmatpush.msra.mxu2 %v2236_v1  ;;  %656 = vmatpush.msra.mxu3 %v2229_v61  ;;  %v478_v35 = vsub.f32 %v428_v16, %v2359_v27 }
  0x79   : > { %515 = vmatpush.msra.mxu1 %v514_v28  ;;  %462 = vmatpush.msra.mxu0 %v2233_v0  ;;  %v550_v28 = vand.u32 4294901760, %v549_v13  ;;  %v579_v13 = vsub.f32 %v2357_v25, %v578_v44 }
  0x7a   : > { %610 = vmatpush.msra.mxu2 %v2260_v12  ;;  %658 = vmatpush.msra.mxu3 %v2233_v0  ;;  %v479_v54 = vand.u32 4294901760, %v478_v35 }
  0x7b   : > { %521 = vmatpush.msra.mxu1 %v520_v34  ;;  %464 = vmatpush.msra.mxu0 %v2252_v7  ;;  %v572_v34 = vand.u32 4294901760, %v2347_v15 }
  0x7c   : > { %613 = vmatpush.msra.mxu2 %v2272_v18  ;;  %660 = vmatpush.msra.mxu3 %v2252_v7  ;;  %v480_v9 = vsub.f32 %v478_v35, %v479_v54  ;;  %v1944_v18 = vmov 0  }
  0x7d   : > { %527 = vmatpush.msra.mxu1 %v526_v42  ;;  %466 = vmatpush.msra.mxu0 %v2269_v17  ;;  %v567_v42 = vsub.f32 %v2337_v8, %v566_v22  ;;  %v573_v4 = vsub.f32 %v2347_v15, %v572_v34 }
  0x7e   : > { %616 = vmatpush.msra.mxu2 %v2284_v24  ;;  %662 = vmatpush.msra.mxu3 %v2269_v17  ;;  %v481_v19 = vand.u32 4294901760, %v480_v9 }
  0x7f   : > { %533 = vmatpush.msra.mxu1 %v532_v3  ;;  %468 = vmatpush.msra.mxu0 %v2274_v20  ;;  %v562_v3 = vand.u32 4294901760, %v561_v32  ;;  %v574_v16 = vand.u32 4294901760, %v573_v4 }
  0x80   : > { %619 = vmatpush.msra.mxu2 %v2296_v30  ;;  %664 = vmatpush.msra.mxu3 %v2274_v20 }
  0x81   : > { %539 = vmatpush.msra.mxu1 %v538_v11  ;;  %470 = vmatpush.msra.mxu0 %v2289_v26  ;;  %v568_v11 = vand.u32 4294901760, %v567_v42 }
  0x82   : > { %622 = vmatpush.msra.mxu2 %v2299_v31  ;;  %666 = vmatpush.msra.mxu3 %v2289_v26 }
  0x83   : > { %545 = vmatpush.msra.mxu1 %v544_v21  ;;  %472 = vmatpush.msra.mxu0 %v2312_v37  ;;  %v580_v21 = vand.u32 4294901760, %v579_v13 }
  0x84   : > { %625 = vmatpush.msra.mxu2 %v2315_v43  ;;  %668 = vmatpush.msra.mxu3 %v2312_v37  ;;  %v1735_v43 = vld [vmem:[#allocation4] ss:$0 sm:$0xff] }
  0x85   : > { %551 = vmatpush.msra.mxu1 %v550_v28  ;;  %474 = vmatpush.msra.mxu0 %v2324_v49 }
  0x86   : > { %628 = vmatpush.msra.mxu2 %v2337_v8  ;;  %670 = vmatpush.msra.mxu3 %v2324_v49 }
  0x87   : > { %557 = vmatpush.msra.mxu1 %v556_v38  ;;  %476 = vmatpush.msra.mxu0 %v2328_v2 }
  0x88   : > { %631 = vmatpush.msra.mxu2 %v2347_v15  ;;  %672 = vmatpush.msra.mxu3 %v2328_v2 }
  0x89   : > { %683 = vmatpush.msrb.mxu0 %v488_v58  ;;  %563 = vmatpush.msra.mxu1 %v562_v3  ;;  %v788_v58 = vld [vmem:[#allocation3] sm:$0xff] }
  0x8a   : > { %634 = vmatpush.msra.mxu2 %v2357_v25  ;;  %676 = vmatmul.f32.vlgmr.msra.gmra.mxu3 %v479_v54 }
  0x8b   : > { %687 = vmatpush.msrb.mxu0 %v494_v59  ;;  %569 = vmatpush.msra.mxu1 %v568_v11  ;;  %v795_v59 = vsel %vm793_vm3, %v788_v58, 0 }
  0x8c   : > { %637 = vmatmul.f32.vlgmr.msra.gmra.mxu2 %v478_v35  ;;  %482 = vmatmul.f32.vlgmr.msra.gmra.mxu0 %v481_v19  ;;  %v1945_v19 = vmov 683565275  }
  0x8d   : > { %691 = vmatpush.msrb.mxu0 %v500_v60  ;;  %575 = vmatpush.msra.mxu1 %v574_v16  ;;  %v814_v60 = vand.u32 4294901760, %v795_v59 }
  0x8e   : > { %1734 = vset.pattern.permute.xlu0 %v1944_v18 }
  0x8f   : > { %695 = vmatpush.msrb.mxu0 %v506_v63  ;;  %581 = vmatpush.msra.mxu1 %v580_v21 }
  0x90   : > { %583 = vmatmul.f32.vlgmr.msra.gmra.mxu1 %v2359_v27 }
  0x91   : > { %750 = vmatpush.msrb.mxu1 %v2191_v39  ;;  %699 = vmatpush.msrb.mxu0 %v512_v5 }
  0x93   : > { %752 = vmatpush.msrb.mxu1 %v2193_v40  ;;  %703 = vmatpush.msrb.mxu0 %v518_v6 }
  0x95   : > { %754 = vmatpush.msrb.mxu1 %v2195_v41  ;;  %707 = vmatpush.msrb.mxu0 %v524_v14 }
  0x97   : > { %756 = vmatpush.msrb.mxu1 %v2197_v45  ;;  %711 = vmatpush.msrb.mxu0 %v530_v23 }
  0x99   : > { %758 = vmatpush.msrb.mxu1 %v2199_v46  ;;  %715 = vmatpush.msrb.mxu0 %v536_v29 }
  0x9b   : > { %760 = vmatpush.msrb.mxu1 %v2201_v47  ;;  %719 = vmatpush.msrb.mxu0 %v542_v36 }
  0x9d   : > { %762 = vmatpush.msrb.mxu1 %v2213_v53  ;;  %723 = vmatpush.msrb.mxu0 %v548_v48 }
  0x9f   : > { %764 = vmatpush.msrb.mxu1 %v2229_v61  ;;  %727 = vmatpush.msrb.mxu0 %v554_v62  ;;  %v815_v61 = vsub.f32 %v795_v59, %v814_v60 }
  0xa1   : > { %766 = vmatpush.msrb.mxu1 %v2233_v0  ;;  %731 = vmatpush.msrb.mxu0 %v560_v10  ;;  %v816_v63 = vand.u32 4294901760, %v815_v61 }
  0xa3   : > { %768 = vmatpush.msrb.mxu1 %v2252_v7  ;;  %735 = vmatpush.msrb.mxu0 %v566_v22  ;;  %v817_v0 = vsub.f32 %v815_v61, %v816_v63 }
  0xa5   : > { %770 = vmatpush.msrb.mxu1 %v2269_v17  ;;  %739 = vmatpush.msrb.mxu0 %v572_v34  ;;  %v818_v5 = vand.u32 4294901760, %v817_v0 }
  0xa7   : > { %772 = vmatpush.msrb.mxu1 %v2274_v20  ;;  %743 = vmatpush.msrb.mxu0 %v578_v44 }
  0xa8   : > { %745 = vmatmul.f32.vlgmr.msrb.gmra.mxu0 %v2359_v27 }
  0xa9   : > { %774 = vmatpush.msrb.mxu1 %v2289_v26 }
  0xab   : > { %776 = vmatpush.msrb.mxu1 %v2312_v37 }
  0xad   : > { %778 = vmatpush.msrb.mxu1 %v2324_v49 }
  0xaf   : > { %780 = vmatpush.msrb.mxu1 %v2328_v2 }
  0xb0   : > { %782 = vmatmul.f32.vlgmr.msrb.gmra.mxu1 %v2359_v27 }
 0x109   : > { %v483_v40 = vpop.f32.mrf.mxu0 }
 0x10d   : > { %v584_v39 = vpop.f32.mrf.mxu1  ;;  %v677_v47 = vpop.f32.mrf.mxu3 }
 0x10e   : > { %v585_v41 = vadd.f32 %v584_v39, %v483_v40  ;;  %v1946_v39 = vmov 2475754826  }
 0x10f   : > { %v638_v45 = vpop.f32.mrf.mxu2 }
 0x110   : > { %v639_v46 = vadd.f32 %v638_v45, %v585_v41  ;;  %v1947_v45 = vmov 2131351028  }
 0x112   : > { %v678_v50 = vadd.f32 %v677_v47, %v639_v46 }
 0x125   : > { %v746_v51 = vpop.f32.mrf.mxu0 }
 0x126   : > { %v747_v52 = vadd.f32 %v746_v51, %v678_v50  ;;  %v1948_v50 = vmov 2102212464  }
 0x12d   : > { %v783_v53 = vpop.f32.mrf.mxu1 }
 0x12e   : > { %v784_v55 = vadd.f32 %v783_v53, %v747_v52  ;;  %v1949_v53 = vmov 920167782  }
 0x130   : > { %v786_v56 = vfloor.f32 %v784_v55 }
 0x132   : > { %v787_v57 = vsub.f32 %v784_v55, %v786_v56 }
 0x134   : > { %790 = vrot.lane.b32.xlu0 %v787_v57, %s1943_s6  ;;  %v1950_v57 = vmov 1326507024   ;;  %s2543_s6 = sld [smem:[#allocation11 + %s1348_s15]] }
 0x1a6   : > { %v791_v1 = vpop.permute.xlu0 %790 }
 0x1a7   : > { %v812_v6 = vand.u32 4294901760, %v791_v1 }
 0x1a9   : > { %v839_v7 = vsub.f32 %v791_v1, %v812_v6  ;;  %813 = vmatpush.msrb.mxu2 %v812_v6 }
 0x1aa   : > { %819 = vmatmul.f32.vlgmr.msrb.gmra.mxu2 %v818_v5 }
 0x1ab   : > { %866 = vmatpush.msra.mxu2 %v839_v7  ;;  %v840_v12 = vand.u32 4294901760, %v839_v7 }
 0x1ad   : > { %915 = vmatpush.msrb.mxu2 %v840_v12  ;;  %v841_v14 = vsub.f32 %v839_v7, %v840_v12 }
 0x1af   : > { %v842_v17 = vand.u32 4294901760, %v841_v14 }
 0x1b1   : > { %843 = vmatpush.msrb.mxu3 %v842_v17 }
 0x1b2   : > { %845 = vmatmul.f32.vlgmr.msrb.gmra.mxu3 %v814_v60  ;;  %869 = vmatmul.f32.vlgmr.msra.gmra.mxu2 %v815_v61 }
 0x1b3   : > { %889 = vmatpush.msra.mxu3 %v812_v6 }
 0x1b5   : > { %937 = vmatpush.msrb.mxu3 %v812_v6 }
 0x1ba   : > { %893 = vmatmul.f32.vlgmr.msra.gmra.mxu3 %v816_v63  ;;  %917 = vmatmul.f32.vlgmr.msrb.gmra.mxu2 %v814_v60 }
 0x1c2   : > { %939 = vmatmul.f32.vlgmr.msrb.gmra.mxu3 %v814_v60 }
 0x22d   : > { %v820_v20 = vpop.f32.mrf.mxu2 }
 0x235   : > { %v846_v23 = vpop.f32.mrf.mxu3  ;;  %v870_v24 = vpop.f32.mrf.mxu2 }
 0x236   : > { %v847_v26 = vadd.f32 %v846_v23, %v820_v20 }
 0x238   : > { %v871_v30 = vadd.f32 %v870_v24, %v847_v26 }
 0x23d   : > { %v894_v29 = vpop.f32.mrf.mxu3  ;;  %v918_v36 = vpop.f32.mrf.mxu2 }
 0x23e   : > { %v895_v31 = vadd.f32 %v894_v29, %v871_v30 }
 0x240   : > { %v919_v37 = vadd.f32 %v918_v36, %v895_v31 }
 0x245   : > { %v940_v48 = vpop.f32.mrf.mxu3 }
 0x246   : > { %v941_v49 = vadd.f32 %v940_v48, %v919_v37 }
 0x248   : > { %v947_v62 = vadd.f32 %v1735_v43, %v941_v49 }
 0x24a   : > { %v948_v2 = vfloor.f32 %v947_v62 }
 0x24c   : > { %v949_v8 = vsub.f32 %v947_v62, %v948_v2 }
 0x24e   : > { %957 = vperm.xlu0 %1734, %v949_v8   ;;  %v950_v10 = vadd.f32 %v949_v8, %v791_v1 }
 0x250   : > { %v951_v15 = vfloor.f32 %v950_v10 }
 0x252   : > { %v952_v22 = vsub.f32 %v950_v10, %v951_v15 }
 0x254   : > { %954 = vst.msk [vmem:[#allocation4 - $0x7] sm:$0x80] %vm953_vm4, %v952_v22 }
 0x2c0   : > { %v958_v25 = vpop.permute.xlu0 %957 }
 0x2c1   : > { %v960_v27 = vadd.f32 %v958_v25, %v784_v55 }
 0x2c3   : > { %v961_v28 = vfloor.f32 %v960_v27 }
 0x2c5   : > { %v962_v32 = vsub.f32 %v960_v27, %v961_v28 }
 0x2c7   : > { %v2435_v34 = vmul.f32 6.2831855, %v962_v32 }
 0x2c9   : > { %v967_v35 = vand.u32 2139095040, %v2435_v34  ;;  %v964_v44 = vand.u32 2147483647, %v2435_v34  ;;  %vm966_vm1 = vcmp.lt.s32.totalorder %v2435_v34, 0 }
 0x2cb   : > { %v968_v38 = vshrl.u32 %v967_v35, 23  ;;  %v971_v3 = vand.u32 8388607, %v964_v44  ;;  %vm965_vm2 = vcmp.le.f32.partialorder %v964_v44, 0.7853982 }
 0x2cd   : > { %v1607_v42 = vadd.s32 4294967169, %v968_v38  ;;  %v972_v13 = vor.u32 8388608, %v971_v3 }
 0x2cf   : > { %v974_v54 = vadd.s32 1, %v1607_v42  ;;  %v2452_v1 = vshll.u32 %v972_v13, 8 }
 0x2d1   : > { %vm975_vm5 = vcmp.gt.s32.totalorder %v974_v54, 0  ;;  %v1013_v24 = vand.u32 65535, %v2452_v1  ;;  %v1014_v26 = vshrl.u32 %v2452_v1, 16 }
 0x2d2   : > { %v976_v4 = vsel %vm975_vm5, %v974_v54, 0 }
 0x2d3   : > { %v978_v9 = vand.u32 31, %v976_v4  ;;  %v2443_v16 = vshrl.u32 %v976_v4, 5 }
 0x2d5   : > { %v2441_v11 = vsub.s32 32, %v978_v9  ;;  %v981_v21 = vshll.u32 %v1945_v19, %v978_v9  ;;  %v984_v40 = vshll.u32 %v1946_v39, %v978_v9  ;;  %v987_v47 = vshll.u32 %v1947_v45, %v978_v9 }
 0x2d6   : > { %v990_v52 = vshll.u32 %v1948_v50, %v978_v9  ;;  %v993_v56 = vshll.u32 %v1949_v53, %v978_v9  ;;  %vm996_vm6 = vcmp.lt.s32.totalorder %v2443_v16, 1  ;;  %vm999_vm7 = vcmp.lt.s32.totalorder %v2443_v16, 4 }
 0x2d7   : > { %v982_v41 = vshrl.u32 %v1946_v39, %v2441_v11  ;;  %v985_v46 = vshrl.u32 %v1947_v45, %v2441_v11  ;;  %v988_v51 = vshrl.u32 %v1948_v50, %v2441_v11  ;;  %v991_v55 = vshrl.u32 %v1949_v53, %v2441_v11 }
 0x2d8   : > { %v994_v58 = vshrl.u32 %v1950_v57, %v2441_v11  ;;  %vm998_vm8 = vcmp.lt.s32.totalorder %v2443_v16, 3  ;;  %vm997_vm9 = vcmp.lt.s32.totalorder %v2443_v16, 2  ;;  %v980_v9 = vshrl.u32 %v1945_v19, %v2441_v11 }
 0x2d9   : > { %v983_v59 = vor.u32 %v982_v41, %v981_v21  ;;  %v986_v60 = vor.u32 %v985_v46, %v984_v40  ;;  %v989_v61 = vor.u32 %v988_v51, %v987_v47  ;;  %v992_v63 = vor.u32 %v991_v55, %v990_v52 }
 0x2da   : > { %v995_v0 = vor.u32 %v994_v58, %v993_v56 }
 0x2db   : > { %v1004_v5 = vsel %vm996_vm6, %v983_v59, %v986_v60  ;;  %v1008_v6 = vsel %vm996_vm6, %v986_v60, %v989_v61  ;;  %v1005_v7 = vsel %vm999_vm7, %v992_v63, 920167782  ;;  %v1001_v54 = vsel %vm999_vm7, %v989_v61, 2102212464 }
 0x2dc   : > { %v1009_v12 = vsel %vm999_vm7, %v995_v0, 1326507024  ;;  %v1006_v14 = vsel %vm998_vm8, %v989_v61, %v1005_v7  ;;  %v1000_v45 = vsel %vm996_vm6, %v980_v9, %v983_v59  ;;  %v1002_v46 = vsel %vm998_vm8, %v986_v60, %v1001_v54 }
 0x2dd   : > { %v1010_v17 = vsel %vm998_vm8, %v992_v63, %v1009_v12  ;;  %v1007_v20 = vsel %vm997_vm9, %v1004_v5, %v1006_v14  ;;  %v1003_v11 = vsel %vm997_vm9, %v1000_v45, %v1002_v46 }
 0x2de   : > { %v1011_v23 = vsel %vm997_vm9, %v1008_v6, %v1010_v17  ;;  %v1037_v31 = vand.u32 65535, %v1007_v20  ;;  %v1038_v36 = vshrl.u32 %v1007_v20, 16  ;;  %v1057_v56 = vmul.u32 %v2452_v1, %v1003_v11 }
 0x2df   : > { %v1015_v29 = vand.u32 65535, %v1011_v23  ;;  %v1016_v30 = vshrl.u32 %v1011_v23, 16  ;;  %vm1107_vm9 = vweird.f32 %v2435_v34 }
 0x2e0   : > { %v1040_v48 = vmul.u32 %v1038_v36, %v1013_v24  ;;  %v1041_v49 = vmul.u32 %v1037_v31, %v1014_v26  ;;  %v1039_v10 = vmul.u32 %v1037_v31, %v1013_v24  ;;  %v1042_v27 = vmul.u32 %v1038_v36, %v1014_v26 }
 0x2e1   : > { %v1018_v37 = vmul.u32 %v1016_v30, %v1013_v24  ;;  %v1019_v43 = vmul.u32 %v1015_v29, %v1014_v26  ;;  %v1017_v62 = vmul.u32 %v1015_v29, %v1013_v24  ;;  %v1020_v8 = vmul.u32 %v1016_v30, %v1014_v26 }
 0x2e2   : > { %v1043_v15 = vshll.u32 %v1040_v48, 16  ;;  %v1045_v32 = vshll.u32 %v1041_v49, 16  ;;  %v1044_v40 = vshrl.u32 %v1040_v48, 16  ;;  %v1046_v51 = vshrl.u32 %v1041_v49, 16 }
 0x2e3   : > { %v1021_v2 = vshll.u32 %v1018_v37, 16  ;;  %v1023_v22 = vshll.u32 %v1019_v43, 16  ;;  %v1022_v13 = vshrl.u32 %v1018_v37, 16  ;;  %v1024_v47 = vshrl.u32 %v1019_v43, 16 }
 0x2e4   : > { %vm1047_vm11 = vc.u32 %v1039_v10, %v1043_v15  ;;  %v1049_v35 = vadd.s32 %v1043_v15, %v1039_v10 }
 0x2e5   : > { %vm1025_vm10 = vc.u32 %v1017_v62, %v1021_v2  ;;  %v1027_v25 = vadd.s32 %v1021_v2, %v1017_v62  ;;  %v1048_v42 = vsel %vm1047_vm11, 1, %v1944_v18  ;;  %vm1289_vm11 = vcmp.gt.f32.partialorder %v2305_v33, 22050.0 }
 0x2e6   : > { %v1026_v28 = vsel %vm1025_vm10, 1, %v1944_v18  ;;  %v1050_v4 = vadd.s32 %v1048_v42, %v1042_v27  ;;  %vm1051_vm13 = vc.u32 %v1049_v35, %v1045_v32  ;;  %v1053_v55 = vadd.s32 %v1049_v35, %v1045_v32 }
 0x2e7   : > { %v1028_v38 = vadd.s32 %v1026_v28, %v1020_v8  ;;  %vm1029_vm12 = vc.u32 %v1027_v25, %v1023_v22  ;;  %v1052_v39 = vsel %vm1051_vm13, 1, %v1944_v18  ;;  %vm1273_vm10 = vcmp.gt.f32.partialorder %v2305_v33, 0.0 }
 0x2e8   : > { %v1030_v3 = vsel %vm1029_vm12, 1, %v1944_v18  ;;  %v1054_v41 = vadd.s32 %v1052_v39, %v1050_v4  ;;  %vm1305_vm12 = vcmp.gt.f32.partialorder %v2305_v33, 11025.0  ;;  %vm1322_vm13 = vcmp.gt.f32.partialorder %v2305_v33, 7350.0 }
 0x2e9   : > { %v1032_v21 = vadd.s32 %v1030_v3, %v1028_v38 }
 0x2ea   : > { %v1055_v52 = vadd.s32 %v1054_v41, %v1044_v40 }
 0x2eb   : > { %v1033_v50 = vadd.s32 %v1032_v21, %v1022_v13 }
 0x2ec   : > { %v1056_v19 = vadd.s32 %v1055_v52, %v1046_v51 }
 0x2ed   : > { %v1034_v53 = vadd.s32 %v1033_v50, %v1024_v47 }
 0x2ee   : > { %v1060_v18 = vadd.s32 1, %v1056_v19 }
 0x2ef   : > { %vm1059_vm14 = vc.u32 %v1034_v53, %v1053_v55  ;;  %v1058_v16 = vadd.s32 %v1053_v55, %v1034_v53 }
 0x2f0   : > { %v1061_v57 = vsel %vm1059_vm14, %v1060_v18, %v1056_v19  ;;  %vm1339_vm14 = vcmp.gt.f32.partialorder %v2305_v33, 5512.5 }
 0x2f1   : > { %v1062_v58 = vadd.s32 %v1061_v57, %v1057_v56 }
 0x2f3   : > { %v1063_v59 = vadd.s32 536870912, %v1062_v58 }
 0x2f5   : > { %v1064_v61 = vshrl.u32 %v1063_v59, 30 }
 0x2f7   : > { %v1065_v63 = vshll.u32 %v1064_v61, 30  ;;  %v1088_v48 = vsub.s32 4, %v1064_v61 }
 0x2f9   : > { %v1066_v60 = vsub.s32 %v1062_v58, %v1065_v63  ;;  %v1089_v10 = vsel %vm966_vm1, %v1088_v48, %v1064_v61 }
 0x2fa   : > { %v1091_v25 = vsel %vm965_vm2, 0, %v1089_v10 }
 0x2fb   : > { %vm1067_vm15 = vcmp.lt.s32.totalorder %v1066_v60, 0  ;;  %v1068_v0 = vsub.s32 0, %v1066_v60  ;;  %v1108_v38 = vadd.s32 3, %v1091_v25  ;;  %v1263_v4 = vand.u32 3, %v1091_v25 }
 0x2fd   : > { %v1069_v5 = vsel %vm1067_vm15, %v1068_v0, %v1066_v60  ;;  %v1109_v9 = vand.u32 3, %v1108_v38  ;;  %vm1264_vm3 = vcmp.lt.s32.totalorder %v1263_v4, 2  ;;  %vm1265_vm4 = vcmp.eq.s32.totalorder %v1263_v4, 0 }
 0x2fe   : > { %v1070_v6 = vclz %v1069_v5  ;;  %vm1268_vm8 = vcmp.eq.s32.totalorder %v1263_v4, 2  ;;  %vm1356_vm15 = vcmp.gt.f32.partialorder %v2305_v33, 4410.0 }
 0x2ff   : > { %vm1110_vm5 = vcmp.lt.s32.totalorder %v1109_v9, 2  ;;  %vm1111_vm6 = vcmp.eq.s32.totalorder %v1109_v9, 0  ;;  %vm1114_vm7 = vcmp.eq.s32.totalorder %v1109_v9, 2 }
 0x300   : > { %v1608_v7 = vadd.s32 4294967294, %v1070_v6  ;;  %v1299_v6 = vstv %s2516_s27  ;;  %s1382_s27 = sadd.s32 6, %s2496_s28 }
 0x302   : > { %vm1609_vm0 = vcmp.lt.s32.totalorder %v1608_v7, 0 }
 0x303   : > { %v1073_v12 = vsel %vm1609_vm0, 0, %v1608_v7  ;;  %v1951_v7 = vmov 0.0   ;;  %vm1373_vm0 = vcmp.gt.f32.partialorder %v2305_v33, 3675.0 }
 0x304   : > { %v1074_v14 = vsub.s32 32, %v1073_v12  ;;  %v1078_v17 = vsub.s32 4294967266, %v1073_v12  ;;  %v1075_v20 = vshll.u32 %v1066_v60, %v1073_v12  ;;  %v2545_v12 = vsel %vm1273_vm10, 1.0, %v1951_v7 }
 0x305   : > { %v1277_v25 = vsub.f32 1.0, %v2545_v12 }
 0x306   : > { %v1076_v23 = vshrl.u32 %v1058_v16, %v1074_v14  ;;  %v1079_v24 = vadd.s32 127, %v1078_v17  ;;  %v1302_v16 = vstv %s2518_s12  ;;  %s1399_s12 = sadd.s32 7, %s2496_s28 }
 0x307   : > { %s2584_s13 = sld [smem:[#allocation6 + %s1399_s12]] }
 0x308   : > { %v1077_v1 = vor.u32 %v1076_v23, %v1075_v20  ;;  %v1080_v26 = vshll.u32 %v1079_v24, 23  ;;  %v2551_v20 = vmul.f32 0.003, %v2545_v12  ;;  %v1283_v23 = vstv %s2508_s10  ;;  %s2568_s10 = sld [smem:[#allocation6 + %s1382_s27]] }
 0x309   : > { %v1286_v24 = vstv %s2513_s16  ;;  %s2570_s16 = sld [smem:[#allocation11 + %s1382_s27]] }
 0x30a   : > { %v1081_v29 = vor.u32 4788187, %v1080_v26  ;;  %v1084_v31 = vcvt.s32.f32 %v1077_v1  ;;  %v1316_v26 = vstv %s2525_s14  ;;  %s2586_s28 = sld [smem:[#allocation11 + %s1399_s12]] }
 0x30b   : > { %s1414_s14 = sld [smem:[#allocation5]] }
 0x30c   : > { %v1082_v30 = vand.u32 2147483647, %v1081_v29  ;;  %v1319_v29 = vstv %s2527_s0  ;;  %s1616_s0 = sshll.u32 %s1926_s24, 2 }
 0x30e   : > { %v1085_v36 = vmul.f32 %v1084_v31, %v1082_v30 }
 0x310   : > { %v1086_v37 = vxor.u32 2147483648, %v1085_v36 }
 0x312   : > { %v1087_v43 = vsel %vm966_vm1, %v1086_v37, %v1085_v36  ;;  %vm1390_vm1 = vcmp.gt.f32.partialorder %v2305_v33, 3150.0 }
 0x313   : > { %v1090_v49 = vsel %vm965_vm2, %v2435_v34, %v1087_v43  ;;  %vm1407_vm2 = vcmp.gt.f32.partialorder %v2305_v33, 2756.25 }
 0x314   : > { %v1092_v62 = vmul.f32 %v1090_v49, %v1090_v49 }
 0x316   : > { %v1093_v2 = vmul.f32 -0.001358992, %v1092_v62  ;;  %v1100_v8 = vmul.f32 -0.00019511016, %v1092_v62 }
 0x318   : > { %v1094_v15 = vadd.f32 0.041655596, %v1093_v2  ;;  %v1101_v22 = vadd.f32 0.008332121, %v1100_v8  ;;  %v1336_v2 = vstv %s2532_s7 }
 0x31a   : > { %v1095_v27 = vmul.f32 %v1094_v15, %v1092_v62  ;;  %v1102_v28 = vmul.f32 %v1101_v22, %v1092_v62 }
 0x31c   : > { %v1096_v32 = vadd.f32 -0.4999988, %v1095_v27  ;;  %v1103_v35 = vadd.f32 -0.16666654, %v1102_v28  ;;  %v1350_v27 = vstv %s2540_s29  ;;  %s2693_s29 = sld [smem:[#allocation27_spill]] }
 0x31e   : > { %v1097_v42 = vmul.f32 %v1096_v32, %v1092_v62  ;;  %v1104_v54 = vmul.f32 %v1103_v35, %v1092_v62  ;;  %v1333_v62 = vstv %s2529_s19  ;;  %v1353_v35 = vstv %s2543_s6  ;;  %s1430_s19 = sadd.s32 %s1922_s23, %s1616_s0  ;;  %s1434_s6 = sshll.u32 %s330_s18, 4  ;;  %s1435_s6 = int_to_ptr.vmem [resolvable:$true] %s1434_s6 }
 0x31f   : > { %s1617_s15 = sshll.u32 %s1430_s19, 3  ;;  %s1420_s23 = scalar_lea.sflag [#allocation8], %s2116_s5 }
 0x320   : > { %v1098_v3 = vadd.f32 1.0, %v1097_v42  ;;  %v1105_v44 = vadd.f32 1.0, %v1104_v54 }
 0x322   : > { %v1106_v13 = vmul.f32 %v1105_v44, %v1090_v49  ;;  %v1115_v21 = vxor.u32 2147483648, %v1098_v3 }
 0x324   : > { %v1112_v39 = vxor.u32 2147483648, %v1106_v13  ;;  %v1116_v41 = vsel %vm1114_vm7, %v1115_v21, %v1106_v13  ;;  %v1270_v46 = vsel %vm1268_vm8, %v1115_v21, %v1106_v13  ;;  %v1367_v13 = vstv %s2548_s9 }
 0x325   : > { %v1370_v21 = vstv %s2555_s30 }
 0x326   : > { %v1113_v40 = vsel %vm1111_vm6, %v1098_v3, %v1112_v39  ;;  %v1267_v45 = vsel %vm1265_vm4, %v1098_v3, %v1112_v39 }
 0x327   : > { %v1117_v47 = vsel %vm1110_vm5, %v1113_v40, %v1116_v41  ;;  %v1271_v50 = vsel %vm1264_vm3, %v1267_v45, %v1270_v46  ;;  %v1278_v46 = vmul.f32 0.033333335, %v1277_v25 }
 0x328   : > { %v2498_v51 = vsel %vm1107_vm9, nan, %v1117_v47  ;;  %v2500_v52 = vsel %vm1107_vm9, nan, %v1271_v50 }
 0x329   : > { %v1292_v53 = vmul.f32 %v2500_v52, %v2498_v51  ;;  %v1294_v55 = vmul.f32 %v2500_v52, %v2500_v52  ;;  %v1295_v34 = vmul.f32 %v2498_v51, %v2498_v51  ;;  %v1284_v48 = vmul.f32 %v1283_v23, %v2498_v51 }
 0x32a   : > { %v1287_v49 = vmul.f32 %v1286_v24, %v2500_v52 }
 0x32b   : > { %v1293_v11 = vadd.f32 %v1292_v53, %v1292_v53  ;;  %v1296_v19 = vsub.f32 %v1294_v55, %v1295_v34 }
 0x32c   : > { %v1288_v4 = vadd.f32 %v1287_v49, %v1284_v48 }
 0x32d   : > { %v1308_v18 = vmul.f32 %v1293_v11, %v2500_v52  ;;  %v1312_v56 = vmul.f32 %v1293_v11, %v2498_v51  ;;  %v1309_v57 = vmul.f32 %v1296_v19, %v2498_v51  ;;  %v1311_v58 = vmul.f32 %v1296_v19, %v2500_v52 }
 0x32e   : > { %v1300_v1 = vmul.f32 %v1299_v6, %v1293_v11  ;;  %v1303_v31 = vmul.f32 %v1302_v16, %v1296_v19 }
 0x32f   : > { %v1310_v59 = vadd.f32 %v1309_v57, %v1308_v18  ;;  %v1313_v61 = vsub.f32 %v1311_v58, %v1312_v56  ;;  %v1384_v56 = vstv %s2568_s10  ;;  %v1290_v57 = vsel %vm1289_vm11, 0.0, %v1288_v4 }
 0x330   : > { %v1304_v28 = vadd.f32 %v1303_v31, %v1300_v1  ;;  %v1401_v31 = vstv %s2584_s13 }
 0x331   : > { %v1325_v63 = vmul.f32 %v1310_v59, %v2500_v52  ;;  %v1326_v60 = vmul.f32 %v1313_v61, %v2498_v51  ;;  %v1328_v0 = vmul.f32 %v1313_v61, %v2500_v52  ;;  %v1329_v5 = vmul.f32 %v1310_v59, %v2498_v51 }
 0x332   : > { %v1317_v8 = vmul.f32 %v1316_v26, %v1310_v59  ;;  %v1320_v10 = vmul.f32 %v1319_v29, %v1313_v61  ;;  %v1306_v47 = vsel %vm1305_vm12, 0.0, %v1304_v28  ;;  %v1387_v61 = vstv %s2570_s16  ;;  %s1848_s16 = scalar_lea.hbm %s2693_s29, 64 }
 0x333   : > { %v1327_v14 = vadd.f32 %v1326_v60, %v1325_v63  ;;  %v1330_v17 = vsub.f32 %v1328_v0, %v1329_v5  ;;  %v1307_v63 = vadd.f32 %v1306_v47, %v1290_v57 }
 0x334   : > { %v1321_v9 = vadd.f32 %v1320_v10, %v1317_v8 }
 0x335   : > { %v1342_v30 = vmul.f32 %v1327_v14, %v2500_v52  ;;  %v1343_v36 = vmul.f32 %v1330_v17, %v2498_v51  ;;  %v1345_v37 = vmul.f32 %v1330_v17, %v2500_v52  ;;  %v1346_v43 = vmul.f32 %v1327_v14, %v2498_v51 }
 0x336   : > { %v1334_v32 = vmul.f32 %v1333_v62, %v1327_v14  ;;  %v1337_v42 = vmul.f32 %v1336_v2, %v1330_v17  ;;  %v1323_v58 = vsel %vm1322_vm13, 0.0, %v1321_v9 }
 0x337   : > { %v1344_v15 = vadd.f32 %v1343_v36, %v1342_v30  ;;  %v1347_v22 = vsub.f32 %v1345_v37, %v1346_v43  ;;  %v1324_v7 = vadd.f32 %v1323_v58, %v1307_v63  ;;  %v1404_v36 = vstv %s2586_s28 }
 0x338   : > { %v1338_v50 = vadd.f32 %v1337_v42, %v1334_v32 }
 0x339   : > { %v1359_v38 = vmul.f32 %v1344_v15, %v2500_v52  ;;  %v1360_v54 = vmul.f32 %v1347_v22, %v2498_v51  ;;  %v1362_v3 = vmul.f32 %v1347_v22, %v2500_v52  ;;  %v1363_v44 = vmul.f32 %v1344_v15, %v2498_v51 }
 0x33a   : > { %v1351_v39 = vmul.f32 %v1350_v27, %v1344_v15  ;;  %v1354_v40 = vmul.f32 %v1353_v35, %v1347_v22  ;;  %v1340_v5 = vsel %vm1339_vm14, 0.0, %v1338_v50  ;;  %v1411_v15 = vld [vmem:[%s297_s17] sm:$0xff]  ;;  %v1280_v22 = vmul.f32 0.1, %v2545_v12  ;;  %s1432_s17 = scalar_lea.hbm %s2693_s29, %s1617_s15 }
 0x33b   : > { %v1361_v41 = vadd.f32 %v1360_v54, %v1359_v38  ;;  %v1364_v45 = vsub.f32 %v1362_v3, %v1363_v44  ;;  %v1341_v29 = vadd.f32 %v1340_v5, %v1324_v7  ;;  %v1415_v38 = vstv %s1414_s14  ;;  %s1436_s24 = sshll.u32 %s1432_s17, 4  ;;  %s1437_s24 = int_to_ptr.hbm [resolvable:$true] %s1436_s24 }
 0x33c   : > { %v1355_v59 = vadd.f32 %v1354_v40, %v1351_v39  ;;  %s1842_s9 = sshra.s32 %s1437_s24, 4  ;;  %s1843_s9 = int_to_ptr.hbm [resolvable:$true] %s1842_s9 }
 0x33d   : > { %v1368_v53 = vmul.f32 %v1367_v13, %v1361_v41  ;;  %v1371_v55 = vmul.f32 %v1370_v21, %v1364_v45  ;;  %v1376_v34 = vmul.f32 %v1361_v41, %v2500_v52  ;;  %v1377_v11 = vmul.f32 %v1364_v45, %v2498_v51  ;;  %s1844_s30 = scalar_lea.hbm %s1843_s9, 8  ;;  %p1849_p11 = scmp.lt.s32.totalorder %s1843_s9, %s2693_s29 }
 0x33e   : > { %v1379_v19 = vmul.f32 %v1364_v45, %v2500_v52  ;;  %v1380_v18 = vmul.f32 %v1361_v41, %v2498_v51  ;;  %v1357_v23 = vsel %vm1356_vm15, 0.0, %v1355_v59  ;;  %p1845_p4 = scmp.ne.s32.totalorder %s1843_s9, %s1844_s30  ;;  %p1850_p12 = scmp.lt.s32.totalorder %s1848_s16, %s1844_s30 }
 0x33f   : > { %v1378_v60 = vadd.f32 %v1377_v11, %v1376_v34  ;;  %v1372_v6 = vadd.f32 %v1371_v55, %v1368_v53  ;;  %v1358_v49 = vadd.f32 %v1357_v23, %v1341_v29 }
 0x340   : > { %v1381_v0 = vsub.f32 %v1379_v19, %v1380_v18  ;;  %p1846_p8 = pnand %p1845_p4, %p2080_p5  ;;  %p1851_p13 = por %p1850_p12, %p1849_p11 }
 0x341   : > { %v1385_v16 = vmul.f32 %v1384_v56, %v1378_v60  ;;  %v1393_v17 = vmul.f32 %v1378_v60, %v2500_v52  ;;  %v1397_v26 = vmul.f32 %v1378_v60, %v2498_v51  ;;  %v1374_v37 = vsel %vm1373_vm0, 0.0, %v1372_v6 }
 0x342   : > { %v1388_v14 = vmul.f32 %v1387_v61, %v1381_v0  ;;  %v1394_v24 = vmul.f32 %v1381_v0, %v2498_v51  ;;  %v1396_v1 = vmul.f32 %v1381_v0, %v2500_v52  ;;  %v1279_v52 = vadd.f32 %v1278_v46, %v2551_v20  ;;  %p1847_p10 = pneg %p1846_p8 }
 0x343   : > { %v1375_v51 = vadd.f32 %v1374_v37, %v1358_v49 }
 0x344   : > { %v1389_v30 = vadd.f32 %v1388_v14, %v1385_v16  ;;  %v1395_v43 = vadd.f32 %v1394_v24, %v1393_v17  ;;  %v1398_v48 = vsub.f32 %v1396_v1, %v1397_v26  ;;  %v1412_v32 = vmul.f32 %v1411_v15, %v1279_v52  ;;  %p1852_p0 = pnand %p1851_p13, %p1847_p10 }
 0x346   : > { %v1391_v62 = vsel %vm1390_vm1, 0.0, %v1389_v30  ;;  %v1402_v2 = vmul.f32 %v1401_v31, %v1395_v43  ;;  %v1405_v8 = vmul.f32 %v1404_v36, %v1398_v48 }
 0x347   : > { %v1392_v25 = vadd.f32 %v1391_v62, %v1375_v51 }
 0x348   : > { %v1406_v10 = vadd.f32 %v1405_v8, %v1402_v2 }
 0x34a   : > { %v1408_v27 = vsel %vm1407_vm2, 0.0, %v1406_v10 }
 0x34b   : > { %v1409_v28 = vadd.f32 %v1408_v27, %v1392_v25 }
 0x34d   : > { %v1410_v35 = vmul.f32 %v1409_v28, %v1280_v22 }
 0x34f   : > { %v1413_v20 = vadd.f32 %v1412_v32, %v1410_v35 }
 0x351   : > { %v1416_v33 = vadd.f32 %v1415_v38, %v1413_v20 }
 0x353   : > { %1736 = vtanh.f32 %v1416_v33 }
 0x359   : > { %v1737_v12 = vpop.eup %1736 }
 0x35a   : > { %1418 = vst [vmem:[%s330_s18] sm:$0xff] %v1737_v12 }
 0x35b   : > { %1855 = shalt.err (!%p1852_p0)
}
 0x35c   : > { %1632 = dma.vmem_to_hbm [thread:$0]  (%p2080_p5), %s1435_s6, 128, %s1437_s24, %s1420_s23  }
 0x35d PF: > { %s2694_s5 = sld [smem:[#allocation21_spill]]  ;;  %p1657_p3 = scmp.ge.s32.totalorder %s1938_s26, 2 }
 0x35f   : > { %p1649_p7 = pnand %p1657_p3, %p2044_p6 }
 0x361   : > { %p1650_p9 = pneg %p1649_p7 }
 0x363   : > { %s1448_s18 = sand.u32 1, %s2694_s5  }
 0x364   : > { %s1449_s28 = scalar_lea.sflag [#allocation8], %s1448_s18 }
 0x365   : > { %1905 = dma.done.wait (%p1650_p9), %s1449_s28, 128  }
 0x366   : > { %1907 = vsyncadd (%p1650_p9), %s1449_s28, 4294967168  ;;  %s27_s26 = sadd.s32 1, %s1938_s26   ;;  %s2696_s8 = sld [smem:[#allocation23_spill]] }
 0x367   : > { %p24_p2 = scmp.ge.s32.totalorder %s27_s26, 10   ;;  %s2697_s14 = sld [smem:[#allocation24_spill]] }
 0x368   : > { %s2698_s20 = smov %s1914_s21  ;;  %s2699_s21 = smov %s1918_s22 }
 0x369   : > { %s2700_s22 = smov %s2093_s1  ;;  %s2701_s23 = smov %s1930_s25 }
 0x36a   : > { %s2702_s24 = smov %s1934_s2  ;;  %26 = sbr.rel (!%p24_p2) target bundleno = 16 (0x10), region = 112 }
 0x36c   : > { %s2703_s25 = smov %s2696_s8 }
 0x36d   : > { %s2704_s2 = smov %s2697_s14 }
 0x36f   :  { %1455 = vsyncpa [#allocation7], 1 }
 0x370   :  { %1457 = vsyncpa [#allocation7 + $0x1], 1 }
 0x371   :  { %1458 = vsyncpa [#allocation14], 1 }
 0x372   :  { %1460 = vsyncpa [#allocation14 + $0x1], 1 }
 0x373   :  { %1461 = vsyncpa [#allocation8], 1 }
 0x374   :  { %1463 = vsyncpa [#allocation8 + $0x1], 1 }
 0x375   :  { %1464 = vsyncpa [#allocation9], 1 }
 0x376   :  { %1466 = vsyncpa [#allocation9 + $0x1], 1 }
 0x377   :  { %1467 = vsyncpa [#allocation10], 1 }
 0x378   :  { %1469 = vsyncpa [#allocation10 + $0x1], 1 }

</bundles_post_ra>
